<compile_context>
chip_gen: v7x
topology: tpu7x:2x2x1
jax: 0.10.0
libtpu: 0.0.40
codegen_flags: <defaults>
</compile_context>

<pallas_src>
import functools

import jax
import jax.numpy as jnp
from jax.experimental import pallas as pl
from jax.experimental.pallas import tpu as pltpu

_LANE = 128
_SUBLANE = 8
_VMEM_TILE_BUDGET = 24 * 1024 * 1024   # per-step double-buffered slab budget
_VMEM_LIMIT_BYTES = 48 * 1024 * 1024   # scoped VMEM request (safe on v5e/v6e/v7x)


def _round_up(n, m):
    return ((n + m - 1) // m) * m


def _batch_tile(batch, bytes_per_sample):
    """Pick batch tile Bt: close to 8 if it fits the VMEM budget, but keep the
    grid >= 2 steps so the 'parallel' axis can shard across 2 TCs (v7x)."""
    bt = max(1, min(8, batch))
    while bt > 1 and bt * bytes_per_sample > _VMEM_TILE_BUDGET:
        bt //= 2
    while bt > 1 and -(-batch // bt) < 2:
        bt //= 2
    padded = _round_up(batch, bt)
    return bt, padded, padded // bt


# ---------------------------------------------------------------------------
# Kernel 1: fused (inference-mode) BatchNorm + ReLU, elementwise.
# ---------------------------------------------------------------------------
def _bn_relu_kernel(x_ref, scale_ref, shift_ref, o_ref):
    # x_ref: (Bt, Cp, HWp); scale/shift: (1, Cp, 1) -> pure lane/dim0 broadcast.
    o_ref[...] = jnp.maximum(x_ref[...] * scale_ref[...] + shift_ref[...], 0.0)


def bn_relu(x, gamma, beta, mean, var, eps=1e-5):
    """relu(batchnorm(x)) with running stats folded into per-channel scale/shift."""
    B, C, H, W = x.shape
    HW = H * W
    HWp = _round_up(HW, _LANE)     # lane-dense stored last dim
    Cp = _round_up(C, _SUBLANE)

    scale = gamma * jax.lax.rsqrt(var + eps)
    shift = beta - mean * scale
    scale_p = jnp.pad(scale, (0, Cp - C)).reshape(1, Cp, 1)
    shift_p = jnp.pad(shift, (0, Cp - C)).reshape(1, Cp, 1)

    bt, Bp, grid_b = _batch_tile(B, 4 * Cp * HWp * 4)  # in+out, double-buffered

    x_p = jnp.pad(x.reshape(B, C, HW), ((0, Bp - B), (0, Cp - C), (0, HWp - HW)))

    cost = pl.CostEstimate(flops=2 * Bp * Cp * HWp, transcendentals=0,
                           bytes_accessed=2 * Bp * Cp * HWp * 4)

    out_p = pl.pallas_call(
        _bn_relu_kernel,
        out_shape=jax.ShapeDtypeStruct((Bp, Cp, HWp), x.dtype),
        grid_spec=pltpu.PrefetchScalarGridSpec(
            num_scalar_prefetch=0,
            grid=(grid_b,),
            in_specs=[
                pl.BlockSpec((bt, Cp, HWp), lambda b: (b, 0, 0)),
                pl.BlockSpec((1, Cp, 1), lambda b: (0, 0, 0)),
                pl.BlockSpec((1, Cp, 1), lambda b: (0, 0, 0)),
            ],
            out_specs=pl.BlockSpec((bt, Cp, HWp), lambda b: (b, 0, 0)),
        ),
        compiler_params=pltpu.CompilerParams(
            dimension_semantics=("parallel",),
            vmem_limit_bytes=_VMEM_LIMIT_BYTES),
        cost_estimate=cost,
    )(x_p, scale_p, shift_p)

    return out_p[:B, :C, :HW].reshape(B, C, H, W)


# ---------------------------------------------------------------------------
# Kernel 2: fused SE gate + residual add.
# ---------------------------------------------------------------------------
def _se_scale_add_kernel(x_ref, r_ref, w1t_ref, b1_ref, w2t_ref, b2_ref, o_ref,
                         *, inv_hw):
    x = x_ref[...]                                    # (Bt, Cp, HWp) f32
    # Squeeze: padded lanes are zeros, so sum * (1/true_HW) == true mean.
    # (If XLU-bound on v6e this reduce could be moved to the MXU via a
    #  ones-vector matmul; the kernel is HBM-bound so we keep the simple form.)
    pooled = jnp.sum(x, axis=-1) * inv_hw             # (Bt, Cp)
    # Excitation: Linear -> ReLU -> Linear -> Sigmoid (weights pre-transposed,
    # hidden dim padded to 128 -> lane-dense MXU tiles).
    h = jnp.dot(pooled, w1t_ref[...],
                preferred_element_type=jnp.float32) + b1_ref[...]   # (Bt, Hd)
    h = jnp.maximum(h, 0.0)
    s = jnp.dot(h, w2t_ref[...],
                preferred_element_type=jnp.float32) + b2_ref[...]   # (Bt, Cp)
    s = jax.nn.sigmoid(s)
    # Scale + residual add, fused (one HBM read of x/res, one write of out).
    o_ref[...] = x * s[:, :, None] + r_ref[...]


def se_scale_add(x, residual, w1, b1, w2, b2):
    """out = x * sigmoid(fc2(relu(fc1(mean_hw(x))))) + residual.

    x, residual: (B, C, H, W) f32. w1: (hidden, C), b1: (hidden,),
    w2: (C, hidden), b2: (C,)   (PyTorch nn.Linear layouts).
    """
    B, C, H, W = x.shape
    hidden = w1.shape[0]
    HW = H * W

    HWp = _round_up(HW, _LANE)       # lane-dense stored last dim
    Cp = _round_up(C, _SUBLANE)      # sublane-friendly channel dim
    Hd = _round_up(hidden, _LANE)    # lane-dense hidden dim for the FC tiles

    # x + residual inputs and the output, all double-buffered, f32.
    bt, Bp, grid_b = _batch_tile(B, 6 * Cp * HWp * 4)
    # NOTE: if even Bt=1 exceeded the budget (huge C*HW), a two-pass variant
    # splitting HW into a second grid axis would be needed; SE feature maps in
    # this model fit comfortably at Bt>=1.

    def pad3(a):
        a = a.reshape(B, C, HW)
        return jnp.pad(a, ((0, Bp - B), (0, Cp - C), (0, HWp - HW)))

    x_p = pad3(x)
    r_p = pad3(residual)

    # Pre-transpose + zero-pad weights: padded hidden units see zero weights and
    # zero bias, and feed zero rows of w2t, so the result is exact.
    w1t = jnp.pad(jnp.transpose(w1), ((0, Cp - C), (0, Hd - hidden)))   # (Cp, Hd)
    w2t = jnp.pad(jnp.transpose(w2), ((0, Hd - hidden), (0, Cp - C)))   # (Hd, Cp)
    b1r = jnp.pad(b1, (0, Hd - hidden)).reshape(1, Hd)
    b2r = jnp.pad(b2, (0, Cp - C)).reshape(1, Cp)

    kernel = functools.partial(_se_scale_add_kernel, inv_hw=1.0 / HW)

    cost = pl.CostEstimate(
        flops=3 * Bp * Cp * HWp + 4 * Bp * Cp * Hd,
        transcendentals=Bp * Cp,
        bytes_accessed=(3 * Bp * Cp * HWp + 2 * Cp * Hd + Hd + Cp) * 4)

    out_p = pl.pallas_call(
        kernel,
        out_shape=jax.ShapeDtypeStruct((Bp, Cp, HWp), x.dtype),
        grid_spec=pltpu.PrefetchScalarGridSpec(
            num_scalar_prefetch=0,
            grid=(grid_b,),
            in_specs=[
                pl.BlockSpec((bt, Cp, HWp), lambda b: (b, 0, 0)),
                pl.BlockSpec((bt, Cp, HWp), lambda b: (b, 0, 0)),
                pl.BlockSpec((Cp, Hd), lambda b: (0, 0)),   # resident weights
                pl.BlockSpec((1, Hd), lambda b: (0, 0)),
                pl.BlockSpec((Hd, Cp), lambda b: (0, 0)),
                pl.BlockSpec((1, Cp), lambda b: (0, 0)),
            ],
            out_specs=pl.BlockSpec((bt, Cp, HWp), lambda b: (b, 0, 0)),
        ),
        compiler_params=pltpu.CompilerParams(
            dimension_semantics=("parallel",),
            vmem_limit_bytes=_VMEM_LIMIT_BYTES),
        cost_estimate=cost,
    )(x_p, r_p, w1t, b1r, w2t, b2r)

    return out_p[:B, :C, :HW].reshape(B, C, H, W)


# ---------------------------------------------------------------------------
# IRBlock forward.
# ---------------------------------------------------------------------------
def conv3x3(x, w, stride=1):
    # TODO(synk): the 3x3 convolutions stay on XLA's conv engine; a hand-written
    # Pallas im2col/matmul conv is out of scope for this block.
    return jax.lax.conv_general_dilated(
        x, w,
        window_strides=(stride, stride),
        padding=((1, 1), (1, 1)),
        dimension_numbers=("NCHW", "OIHW", "NCHW"),
        precision=jax.lax.Precision.HIGHEST)


def ir_block(x, params, *, stride=1, downsample=None, use_se=True):
    """Pre-activation IR block: BN-ReLU-conv3x3-BN-ReLU-conv3x3-[SE]-(+residual)."""
    residual = x
    out = bn_relu(x, params["bn1_gamma"], params["bn1_beta"],
                  params["bn1_mean"], params["bn1_var"])
    out = conv3x3(out, params["conv1_w"], stride=1)
    out = bn_relu(out, params["bn2_gamma"], params["bn2_beta"],
                  params["bn2_mean"], params["bn2_var"])
    out = conv3x3(out, params["conv2_w"], stride=stride)
    if downsample is not None:
        residual = downsample(x)
    if use_se:
        # SE gate and the residual add fused into a single Pallas pass.
        out = se_scale_add(out, residual,
                           params["se_w1"], params["se_b1"],
                           params["se_w2"], params["se_b2"])
    else:
        out = out + residual
    return out


# ---------------------------------------------------------------------------
# Pure-JAX reference mirroring the PyTorch forward (inference-mode BN).
# ---------------------------------------------------------------------------
def _reference_ir_block(x, params, *, stride=1, downsample=None, use_se=True,
                        eps=1e-5):
    def bn(h, g, b, m, v):
        return ((h - m[None, :, None, None])
                * jax.lax.rsqrt(v + eps)[None, :, None, None]
                * g[None, :, None, None] + b[None, :, None, None])

    hp = jax.lax.Precision.HIGHEST
    residual = x
    out = jnp.maximum(bn(x, params["bn1_gamma"], params["bn1_beta"],
                         params["bn1_mean"], params["bn1_var"]), 0.0)
    out = conv3x3(out, params["conv1_w"], stride=1)
    out = jnp.maximum(bn(out, params["bn2_gamma"], params["bn2_beta"],
                         params["bn2_mean"], params["bn2_var"]), 0.0)
    out = conv3x3(out, params["conv2_w"], stride=stride)
    if use_se:
        y = jnp.mean(out, axis=(2, 3))
        h = jnp.maximum(jnp.dot(y, params["se_w1"].T, precision=hp)
                        + params["se_b1"], 0.0)
        s = jax.nn.sigmoid(jnp.dot(h, params["se_w2"].T, precision=hp)
                           + params["se_b2"])
        out = out * s[:, :, None, None]
    if downsample is not None:
        residual = downsample(x)
    return out + residual


if __name__ == "__main__":
    B, C, H, W = 16, 32, 14, 14     # inplanes == planes == 32, stride 1
    reduction = 16
    hidden = C // reduction         # 2

    key = jax.random.PRNGKey(0)
    ks = jax.random.split(key, 16)

    x = jax.random.normal(ks[0], (B, C, H, W), dtype=jnp.float32)

    params = {
        "bn1_gamma": 1.0 + 0.1 * jax.random.normal(ks[1], (C,), jnp.float32),
        "bn1_beta": 0.1 * jax.random.normal(ks[2], (C,), jnp.float32),
        "bn1_mean": 0.1 * jax.random.normal(ks[3], (C,), jnp.float32),
        "bn1_var": 1.0 + 0.1 * jnp.abs(jax.random.normal(ks[4], (C,), jnp.float32)),
        "conv1_w": 0.08 * jax.random.normal(ks[5], (C, C, 3, 3), jnp.float32),
        "bn2_gamma": 1.0 + 0.1 * jax.random.normal(ks[6], (C,), jnp.float32),
        "bn2_beta": 0.1 * jax.random.normal(ks[7], (C,), jnp.float32),
        "bn2_mean": 0.1 * jax.random.normal(ks[8], (C,), jnp.float32),
        "bn2_var": 1.0 + 0.1 * jnp.abs(jax.random.normal(ks[9], (C,), jnp.float32)),
        "conv2_w": 0.08 * jax.random.normal(ks[10], (C, C, 3, 3), jnp.float32),
        "se_w1": 0.1 * jax.random.normal(ks[11], (hidden, C), jnp.float32),
        "se_b1": 0.1 * jax.random.normal(ks[12], (hidden,), jnp.float32),
        "se_w2": 0.1 * jax.random.normal(ks[13], (C, hidden), jnp.float32),
        "se_b2": 0.1 * jax.random.normal(ks[14], (C,), jnp.float32),
    }

    fwd = jax.jit(functools.partial(ir_block, stride=1, downsample=None,
                                    use_se=True))
    out = fwd(x, params)
    jax.block_until_ready(out)

    ref = _reference_ir_block(x, params, stride=1, downsample=None, use_se=True)
    assert out.shape == (B, C, H, W)
    max_err = float(jnp.max(jnp.abs(out - ref)))
    assert jnp.allclose(out, ref, atol=1e-4, rtol=1e-4), f"max abs err {max_err}"

    print("KERNEL_OK")
</pallas_src>

<mosaic_0001>
module attributes {stable_mosaic.version = 11 : i64} {
  func.func @_bn_relu_kernel(%arg0: i32, %arg1: memref<8x32x256xf32, #tpu.memory_space<vmem>>, %arg2: memref<1x32x1xf32, #tpu.memory_space<vmem>>, %arg3: memref<1x32x1xf32, #tpu.memory_space<vmem>>, %arg4: memref<8x32x256xf32, #tpu.memory_space<vmem>>) attributes {dimension_semantics = [#tpu.dimension_semantics<parallel>], iteration_bounds = array<i64: 2>, scalar_prefetch = 0 : i64, scratch_operands = 0 : i64, tpu.core_type = #tpu.core_type<tc>, window_params = [{transform_indices = @transform_0, window_bounds = array<i64: 8, 32, 256>}, {pipeline_mode = #tpu.pipeline_mode<synchronous>, transform_indices = @transform_1, window_bounds = array<i64: 1, 32, 1>}, {pipeline_mode = #tpu.pipeline_mode<synchronous>, transform_indices = @transform_2, window_bounds = array<i64: 1, 32, 1>}, {transform_indices = @transform_3, window_bounds = array<i64: 8, 32, 256>}]} {
    %c0 = arith.constant 0 : index
    %c0_0 = arith.constant 0 : index
    %c0_1 = arith.constant 0 : index
    %0 = vector.load %arg1[%c0, %c0_0, %c0_1] : memref<8x32x256xf32, #tpu.memory_space<vmem>>, vector<8x32x256xf32>
    %c0_2 = arith.constant 0 : index
    %c0_3 = arith.constant 0 : index
    %c0_4 = arith.constant 0 : index
    %1 = vector.load %arg2[%c0_2, %c0_3, %c0_4] : memref<1x32x1xf32, #tpu.memory_space<vmem>>, vector<1x32x1xf32>
    %2 = vector.broadcast %1 : vector<1x32x1xf32> to vector<8x32x256xf32>
    %3 = arith.mulf %0, %2 : vector<8x32x256xf32>
    %c0_5 = arith.constant 0 : index
    %c0_6 = arith.constant 0 : index
    %c0_7 = arith.constant 0 : index
    %4 = vector.load %arg3[%c0_5, %c0_6, %c0_7] : memref<1x32x1xf32, #tpu.memory_space<vmem>>, vector<1x32x1xf32>
    %5 = vector.broadcast %4 : vector<1x32x1xf32> to vector<8x32x256xf32>
    %6 = arith.addf %3, %5 : vector<8x32x256xf32>
    %cst = arith.constant 0.000000e+00 : f32
    %7 = vector.broadcast %cst : f32 to vector<8x32x256xf32>
    %8 = arith.maximumf %6, %7 : vector<8x32x256xf32>
    %c0_8 = arith.constant 0 : index
    %c0_9 = arith.constant 0 : index
    %c0_10 = arith.constant 0 : index
    %9 = vector.load %arg4[%c0_8, %c0_9, %c0_10] : memref<8x32x256xf32, #tpu.memory_space<vmem>>, vector<8x32x256xf32>
    tpu.vector_store %arg4[%c0_8, %c0_9, %c0_10], %8 {strides = array<i32>} : memref<8x32x256xf32, #tpu.memory_space<vmem>>, vector<8x32x256xf32>,
    return
  }
  func.func @transform_0(%arg0: i32) -> (i32, i32, i32) {
    %c0_i32 = arith.constant 0 : i32
    %c0_i32_0 = arith.constant 0 : i32
    %c0_i32_1 = arith.constant 0 : i32
    return %arg0, %c0_i32, %c0_i32_0 : i32, i32, i32
  }
  func.func @transform_1(%arg0: i32) -> (i32, i32, i32) {
    %c0_i32 = arith.constant 0 : i32
    %c0_i32_0 = arith.constant 0 : i32
    %c0_i32_1 = arith.constant 0 : i32
    %c0_i32_2 = arith.constant 0 : i32
    return %c0_i32, %c0_i32_0, %c0_i32_1 : i32, i32, i32
  }
  func.func @transform_2(%arg0: i32) -> (i32, i32, i32) {
    %c0_i32 = arith.constant 0 : i32
    %c0_i32_0 = arith.constant 0 : i32
    %c0_i32_1 = arith.constant 0 : i32
    %c0_i32_2 = arith.constant 0 : i32
    return %c0_i32, %c0_i32_0, %c0_i32_1 : i32, i32, i32
  }
  func.func @transform_3(%arg0: i32) -> (i32, i32, i32) {
    %c0_i32 = arith.constant 0 : i32
    %c0_i32_0 = arith.constant 0 : i32
    %c0_i32_1 = arith.constant 0 : i32
    return %arg0, %c0_i32, %c0_i32_0 : i32, i32, i32
  }
}

module attributes {stable_mosaic.version = 11 : i64} {
  func.func @_se_scale_add_kernel(%arg0: i32, %arg1: memref<8x32x256xf32, #tpu.memory_space<vmem>>, %arg2: memref<8x32x256xf32, #tpu.memory_space<vmem>>, %arg3: memref<32x128xf32, #tpu.memory_space<vmem>>, %arg4: memref<1x128xf32, #tpu.memory_space<vmem>>, %arg5: memref<128x32xf32, #tpu.memory_space<vmem>>, %arg6: memref<1x32xf32, #tpu.memory_space<vmem>>, %arg7: memref<8x32x256xf32, #tpu.memory_space<vmem>>) attributes {dimension_semantics = [#tpu.dimension_semantics<parallel>], iteration_bounds = array<i64: 2>, scalar_prefetch = 0 : i64, scratch_operands = 0 : i64, tpu.core_type = #tpu.core_type<tc>, window_params = [{transform_indices = @transform_0, window_bounds = array<i64: 8, 32, 256>}, {transform_indices = @transform_1, window_bounds = array<i64: 8, 32, 256>}, {pipeline_mode = #tpu.pipeline_mode<synchronous>, transform_indices = @transform_2, window_bounds = array<i64: 32, 128>}, {pipeline_mode = #tpu.pipeline_mode<synchronous>, transform_indices = @transform_3, window_bounds = array<i64: 1, 128>}, {pipeline_mode = #tpu.pipeline_mode<synchronous>, transform_indices = @transform_4, window_bounds = array<i64: 128, 32>}, {pipeline_mode = #tpu.pipeline_mode<synchronous>, transform_indices = @transform_5, window_bounds = array<i64: 1, 32>}, {transform_indices = @transform_6, window_bounds = array<i64: 8, 32, 256>}]} {
    %c0 = arith.constant 0 : index
    %c0_0 = arith.constant 0 : index
    %c0_1 = arith.constant 0 : index
    %0 = vector.load %arg1[%c0, %c0_0, %c0_1] : memref<8x32x256xf32, #tpu.memory_space<vmem>>, vector<8x32x256xf32>
    %cst = arith.constant dense<0.000000e+00> : vector<8x32xf32>
    %1 = vector.multi_reduction <add>, %0, %cst [2] : vector<8x32x256xf32> to vector<8x32xf32>
    %cst_2 = arith.constant 0.00510204071 : f32
    %2 = vector.broadcast %cst_2 : f32 to vector<8x32xf32>
    %3 = arith.mulf %1, %2 : vector<8x32xf32>
    %c0_3 = arith.constant 0 : index
    %c0_4 = arith.constant 0 : index
    %4 = vector.load %arg3[%c0_3, %c0_4] : memref<32x128xf32, #tpu.memory_space<vmem>>, vector<32x128xf32>
    %cst_5 = arith.constant dense<0.000000e+00> : vector<8x128xf32>
    %5 = tpu.matmul %3, %4, %cst_5 {dimension_numbers = #tpu.dot_dimension_numbers<[1], [0], [0], [1], [0, 0, 1, 1], [], []>} : vector<8x32xf32>, vector<32x128xf32>, vector<8x128xf32> -> vector<8x128xf32>
    %c0_6 = arith.constant 0 : index
    %c0_7 = arith.constant 0 : index
    %6 = vector.load %arg4[%c0_6, %c0_7] : memref<1x128xf32, #tpu.memory_space<vmem>>, vector<1x128xf32>
    %7 = vector.broadcast %6 : vector<1x128xf32> to vector<8x128xf32>
    %8 = arith.addf %5, %7 : vector<8x128xf32>
    %cst_8 = arith.constant 0.000000e+00 : f32
    %9 = vector.broadcast %cst_8 : f32 to vector<8x128xf32>
    %10 = arith.maximumf %8, %9 : vector<8x128xf32>
    %c0_9 = arith.constant 0 : index
    %c0_10 = arith.constant 0 : index
    %11 = vector.load %arg5[%c0_9, %c0_10] : memref<128x32xf32, #tpu.memory_space<vmem>>, vector<128x32xf32>
    %cst_11 = arith.constant dense<0.000000e+00> : vector<8x32xf32>
    %12 = tpu.matmul %10, %11, %cst_11 {dimension_numbers = #tpu.dot_dimension_numbers<[1], [0], [0], [1], [0, 0, 1, 1], [], []>} : vector<8x128xf32>, vector<128x32xf32>, vector<8x32xf32> -> vector<8x32xf32>
    %c0_12 = arith.constant 0 : index
    %c0_13 = arith.constant 0 : index
    %13 = vector.load %arg6[%c0_12, %c0_13] : memref<1x32xf32, #tpu.memory_space<vmem>>, vector<1x32xf32>
    %14 = vector.broadcast %13 : vector<1x32xf32> to vector<8x32xf32>
    %15 = arith.addf %12, %14 : vector<8x32xf32>
    %16 = arith.negf %15 : vector<8x32xf32>
    %17 = math.exp %16 : vector<8x32xf32>
    %cst_14 = arith.constant 1.000000e+00 : f32
    %18 = vector.broadcast %cst_14 : f32 to vector<8x32xf32>
    %19 = arith.addf %18, %17 : vector<8x32xf32>
    %20 = arith.divf %18, %19 : vector<8x32xf32>
    %21 = vector.shape_cast %20 : vector<8x32xf32> to vector<8x32x1xf32>
    %22 = vector.broadcast %21 : vector<8x32x1xf32> to vector<8x32x256xf32>
    %23 = arith.mulf %0, %22 : vector<8x32x256xf32>
    %c0_15 = arith.constant 0 : index
    %c0_16 = arith.constant 0 : index
    %c0_17 = arith.constant 0 : index
    %24 = vector.load %arg2[%c0_15, %c0_16, %c0_17] : memref<8x32x256xf32, #tpu.memory_space<vmem>>, vector<8x32x256xf32>
    %25 = arith.addf %23, %24 : vector<8x32x256xf32>
    %c0_18 = arith.constant 0 : index
    %c0_19 = arith.constant 0 : index
    %c0_20 = arith.constant 0 : index
    %26 = vector.load %arg7[%c0_18, %c0_19, %c0_20] : memref<8x32x256xf32, #tpu.memory_space<vmem>>, vector<8x32x256xf32>
    tpu.vector_store %arg7[%c0_18, %c0_19, %c0_20], %25 {strides = array<i32>} : memref<8x32x256xf32, #tpu.memory_space<vmem>>, vector<8x32x256xf32>,
    return
  }
  func.func @transform_0(%arg0: i32) -> (i32, i32, i32) {
    %c0_i32 = arith.constant 0 : i32
    %c0_i32_0 = arith.constant 0 : i32
    %c0_i32_1 = arith.constant 0 : i32
    return %arg0, %c0_i32, %c0_i32_0 : i32, i32, i32
  }
  func.func @transform_1(%arg0: i32) -> (i32, i32, i32) {
    %c0_i32 = arith.constant 0 : i32
    %c0_i32_0 = arith.constant 0 : i32
    %c0_i32_1 = arith.constant 0 : i32
    return %arg0, %c0_i32, %c0_i32_0 : i32, i32, i32
  }
  func.func @transform_2(%arg0: i32) -> (i32, i32) {
    %c0_i32 = arith.constant 0 : i32
    %c0_i32_0 = arith.constant 0 : i32
    %c0_i32_1 = arith.constant 0 : i32
    return %c0_i32, %c0_i32_0 : i32, i32
  }
  func.func @transform_3(%arg0: i32) -> (i32, i32) {
    %c0_i32 = arith.constant 0 : i32
    %c0_i32_0 = arith.constant 0 : i32
    %c0_i32_1 = arith.constant 0 : i32
    return %c0_i32, %c0_i32_0 : i32, i32
  }
  func.func @transform_4(%arg0: i32) -> (i32, i32) {
    %c0_i32 = arith.constant 0 : i32
    %c0_i32_0 = arith.constant 0 : i32
    %c0_i32_1 = arith.constant 0 : i32
    return %c0_i32, %c0_i32_0 : i32, i32
  }
  func.func @transform_5(%arg0: i32) -> (i32, i32) {
    %c0_i32 = arith.constant 0 : i32
    %c0_i32_0 = arith.constant 0 : i32
    %c0_i32_1 = arith.constant 0 : i32
    return %c0_i32, %c0_i32_0 : i32, i32
  }
  func.func @transform_6(%arg0: i32) -> (i32, i32, i32) {
    %c0_i32 = arith.constant 0 : i32
    %c0_i32_0 = arith.constant 0 : i32
    %c0_i32_1 = arith.constant 0 : i32
    return %arg0, %c0_i32, %c0_i32_0 : i32, i32, i32
  }
}

</mosaic_0001>

<bundles_post_ra>
// kernel: ir_block.3
= control target key start
LH: loop header
LB: loop body
LE: loop exit
PB: predicated region body
PF: predicated region fallthrough
CT: control target
= control target key end

     0   :  { %s660_s12 = smov 0   ;;  %s924_s0 = inlined_call_operand.vmem [shape: f32[16,32,256], index: 0, kind: input, shape index: {}]   ;;  %s925_s1 = inlined_call_operand.vmem [shape: f32[1,32,1], index: 1, kind: input, shape index: {}]   ;;  %s926_s2 = inlined_call_operand.vmem [shape: f32[1,32,1], index: 2, kind: input, shape index: {}]   ;;  %s927_s3 = inlined_call_operand.vmem [shape: f32[16,32,256], index: 3, kind: output, shape index: {}]  }
   0x1 LB: > { %s605_s13 = sadd.s32 4294967295, %s637_s12   ;;  %p609_p0 = scmp.ge.s32.totalorder %s637_s12, 1  ;;  %s637_s12 = sphi %s660_s12, %s13_s12  }
   0x2   : > { %p139_p1 = scmp.lt.s32.totalorder %s637_s12, 3 }
   0x4   : > { %p140_p2 = pnand %p609_p0, %p139_p1 }
   0x5   : > { %v245_v0 = vld [vmem:[%s925_s1 + $0x10] sm:$0xff] (!%p140_p2)  ;;  %v243_v1 = vld [vmem:[%s925_s1] sm:$0xff] (!%p140_p2)  ;;  %v639_v2 = vmov (!%p140_p2), 0   ;;  %v246_v3 = vld [vmem:[%s925_s1 + $0x18] sm:$0xff] (!%p140_p2)  ;;  %s610_s30 = sshll.u32 (!%p140_p2), %s605_s13, 3 }
   0x6   : > { %143 = sbr.rel (%p140_p2) target bundleno = 192 (0xc0), region = 32  ;;  %630 = vset.pattern.permute.xlu1 (!%p140_p2), %v639_v2  ;;  %629 = vset.pattern.permute.xlu0 (!%p140_p2), %v639_v2  ;;  %v244_v4 = vld [vmem:[%s925_s1 + $0x8] sm:$0xff] (!%p140_p2)  ;;  %v331_v6 = vld [vmem:[%s926_s2] sm:$0xff] (!%p140_p2)  ;;  %v334_v7 = vld [vmem:[%s926_s2 + $0x18] sm:$0xff] (!%p140_p2)  ;;  %p166_p3 = scmp.lt.s32.totalorder (!%p140_p2), %s610_s30, 15 }
   0x7   : > { %259 = vperm.xlu1 (!%p140_p2), %630, %v245_v0   ;;  %249 = vperm.xlu0 (!%p140_p2), %629, %v243_v1   ;;  %v332_v5 = vld [vmem:[%s926_s2 + $0x8] sm:$0xff] (!%p140_p2)  ;;  %v333_v8 = vld [vmem:[%s926_s2 + $0x10] sm:$0xff] (!%p140_p2) }
   0xb   : > { %264 = vperm.xlu1 (!%p140_p2), %630, %v246_v3   ;;  %254 = vperm.xlu0 (!%p140_p2), %629, %v244_v4  }
   0xd   : > { %s929_s30 = smov (!%p166_p3, %s610_s30), 15 }
   0xe   : > { %s618_s4 = sshll.u32 %s929_s30, 6 }
   0xf   : > { %342 = vperm.xlu1 %630, %v332_v5   ;;  %337 = vperm.xlu0 %629, %v331_v6   ;;  %s700_s7 = scalar_lea.vmem %s924_s0, %s618_s4  ;;  %s775_s10 = scalar_lea.vmem %s927_s3, %s618_s4 }
  0x10   : > { %v179_v9 = vld [vmem:[%s700_s7] sm:$0xff]  ;;  %v180_v10 = vld [vmem:[%s700_s7 + $0x8] sm:$0xff]  ;;  %v181_v27 = vld [vmem:[%s700_s7 + $0x10] sm:$0xff] }
  0x11   : > { %v187_v11 = vld [vmem:[%s700_s7 + $0x40] sm:$0xff]  ;;  %v188_v12 = vld [vmem:[%s700_s7 + $0x48] sm:$0xff]  ;;  %v182_v32 = vld [vmem:[%s700_s7 + $0x18] sm:$0xff] }
  0x12   : > { %v195_v13 = vld [vmem:[%s700_s7 + $0x80] sm:$0xff]  ;;  %v196_v14 = vld [vmem:[%s700_s7 + $0x88] sm:$0xff]  ;;  %v189_v33 = vld [vmem:[%s700_s7 + $0x50] sm:$0xff] }
  0x13   : > { %352 = vperm.xlu1 %630, %v334_v7   ;;  %347 = vperm.xlu0 %629, %v333_v8   ;;  %v203_v15 = vld [vmem:[%s700_s7 + $0xc0] sm:$0xff]  ;;  %v204_v16 = vld [vmem:[%s700_s7 + $0xc8] sm:$0xff]  ;;  %v190_v34 = vld [vmem:[%s700_s7 + $0x58] sm:$0xff] }
  0x14   : > { %v211_v17 = vld [vmem:[%s700_s7 + $0x100] sm:$0xff]  ;;  %v212_v18 = vld [vmem:[%s700_s7 + $0x108] sm:$0xff]  ;;  %v197_v39 = vld [vmem:[%s700_s7 + $0x90] sm:$0xff] }
  0x15   : > { %v219_v19 = vld [vmem:[%s700_s7 + $0x140] sm:$0xff]  ;;  %v220_v20 = vld [vmem:[%s700_s7 + $0x148] sm:$0xff]  ;;  %v198_v40 = vld [vmem:[%s700_s7 + $0x98] sm:$0xff] }
  0x16   : > { %v227_v21 = vld [vmem:[%s700_s7 + $0x180] sm:$0xff]  ;;  %v228_v22 = vld [vmem:[%s700_s7 + $0x188] sm:$0xff]  ;;  %v205_v41 = vld [vmem:[%s700_s7 + $0xd0] sm:$0xff] }
  0x17   : > { %v235_v25 = vld [vmem:[%s700_s7 + $0x1c0] sm:$0xff]  ;;  %v236_v26 = vld [vmem:[%s700_s7 + $0x1c8] sm:$0xff]  ;;  %v206_v46 = vld [vmem:[%s700_s7 + $0xd8] sm:$0xff] }
  0x18   : > { %v213_v47 = vld [vmem:[%s700_s7 + $0x110] sm:$0xff]  ;;  %v214_v48 = vld [vmem:[%s700_s7 + $0x118] sm:$0xff] }
  0x19   : > { %v221_v55 = vld [vmem:[%s700_s7 + $0x150] sm:$0xff]  ;;  %v222_v56 = vld [vmem:[%s700_s7 + $0x158] sm:$0xff] }
  0x1a   : > { %v229_v57 = vld [vmem:[%s700_s7 + $0x190] sm:$0xff]  ;;  %v230_v58 = vld [vmem:[%s700_s7 + $0x198] sm:$0xff] }
  0x1b   : > { %v237_v59 = vld [vmem:[%s700_s7 + $0x1d0] sm:$0xff]  ;;  %v238_v60 = vld [vmem:[%s700_s7 + $0x1d8] sm:$0xff] }
  0x86   : > { %v716_v23 = vpop.permute.xlu1 %259  ;;  %v250_v24 = vpop.permute.xlu0 %249 }
  0x87   : > { %v721_v28 = vmul.f32 %v250_v24, %v179_v9  ;;  %v723_v29 = vmul.f32 %v250_v24, %v180_v10  ;;  %v725_v30 = vmul.f32 %v250_v24, %v187_v11  ;;  %v727_v31 = vmul.f32 %v250_v24, %v188_v12 }
  0x88   : > { %v732_v35 = vmul.f32 %v250_v24, %v195_v13  ;;  %v734_v36 = vmul.f32 %v250_v24, %v196_v14  ;;  %v736_v37 = vmul.f32 %v250_v24, %v203_v15  ;;  %v738_v38 = vmul.f32 %v250_v24, %v204_v16 }
  0x89   : > { %v743_v42 = vmul.f32 %v250_v24, %v211_v17  ;;  %v745_v43 = vmul.f32 %v250_v24, %v212_v18  ;;  %v747_v44 = vmul.f32 %v250_v24, %v219_v19  ;;  %v749_v45 = vmul.f32 %v250_v24, %v220_v20 }
  0x8a   : > { %v754_v49 = vmul.f32 %v250_v24, %v227_v21  ;;  %v756_v50 = vmul.f32 %v250_v24, %v228_v22  ;;  %v758_v51 = vmul.f32 %v250_v24, %v235_v25  ;;  %v760_v52 = vmul.f32 %v250_v24, %v236_v26  ;;  %v762_v53 = vpop.permute.xlu1 %264  ;;  %v255_v54 = vpop.permute.xlu0 %254 }
  0x8b   : > { %v269_v61 = vmul.f32 %v255_v54, %v181_v27  ;;  %v270_v62 = vmul.f32 %v255_v54, %v182_v32  ;;  %v277_v63 = vmul.f32 %v255_v54, %v189_v33  ;;  %v278_v0 = vmul.f32 %v255_v54, %v190_v34 }
  0x8c   : > { %v285_v1 = vmul.f32 %v255_v54, %v197_v39  ;;  %v286_v2 = vmul.f32 %v255_v54, %v198_v40  ;;  %v293_v3 = vmul.f32 %v255_v54, %v205_v41  ;;  %v294_v4 = vmul.f32 %v255_v54, %v206_v46 }
  0x8d   : > { %v301_v5 = vmul.f32 %v255_v54, %v213_v47  ;;  %v302_v6 = vmul.f32 %v255_v54, %v214_v48  ;;  %v309_v7 = vmul.f32 %v255_v54, %v221_v55  ;;  %v310_v8 = vmul.f32 %v255_v54, %v222_v56 }
  0x8e   : > { %v317_v9 = vmul.f32 %v255_v54, %v229_v57  ;;  %v318_v10 = vmul.f32 %v255_v54, %v230_v58  ;;  %v325_v11 = vmul.f32 %v255_v54, %v237_v59  ;;  %v326_v12 = vmul.f32 %v255_v54, %v238_v60  ;;  %v343_v13 = vpop.permute.xlu1 %342  ;;  %v338_v56 = vpop.permute.xlu0 %337 }
  0x8f   : > { %v357_v14 = vadd.f32 %v343_v13, %v269_v61  ;;  %v358_v15 = vadd.f32 %v343_v13, %v270_v62  ;;  %v365_v16 = vadd.f32 %v343_v13, %v277_v63  ;;  %v366_v17 = vadd.f32 %v343_v13, %v278_v0 }
  0x90   : > { %v373_v18 = vadd.f32 %v343_v13, %v285_v1  ;;  %v374_v19 = vadd.f32 %v343_v13, %v286_v2  ;;  %v381_v20 = vadd.f32 %v343_v13, %v293_v3  ;;  %v382_v21 = vadd.f32 %v343_v13, %v294_v4 }
  0x91   : > { %v389_v22 = vadd.f32 %v343_v13, %v301_v5  ;;  %v390_v24 = vadd.f32 %v343_v13, %v302_v6  ;;  %v397_v25 = vadd.f32 %v343_v13, %v309_v7  ;;  %v398_v26 = vadd.f32 %v343_v13, %v310_v8 }
  0x92   : > { %v405_v27 = vadd.f32 %v343_v13, %v317_v9  ;;  %v406_v32 = vadd.f32 %v343_v13, %v318_v10  ;;  %v413_v33 = vadd.f32 %v343_v13, %v325_v11  ;;  %v414_v34 = vadd.f32 %v343_v13, %v326_v12  ;;  %v193_v10 = vld [vmem:[%s700_s7 + $0x70] sm:$0xff] }
  0x93   : > { %v421_v39 = vmax.f32 %v357_v14, 0.0  ;;  %v422_v40 = vmax.f32 %v358_v15, 0.0  ;;  %v429_v41 = vmax.f32 %v365_v16, 0.0  ;;  %v430_v46 = vmax.f32 %v366_v17, 0.0  ;;  %v210_v16 = vld [vmem:[%s700_s7 + $0xf8] sm:$0xff]  ;;  %v217_v17 = vld [vmem:[%s700_s7 + $0x130] sm:$0xff] }
  0x94   : > { %v437_v47 = vmax.f32 %v373_v18, 0.0  ;;  %v438_v48 = vmax.f32 %v374_v19, 0.0  ;;  %v445_v54 = vmax.f32 %v381_v20, 0.0  ;;  %v446_v55 = vmax.f32 %v382_v21, 0.0 }
  0x95   : > { %v453_v57 = vmax.f32 %v389_v22, 0.0  ;;  %v454_v58 = vmax.f32 %v390_v24, 0.0  ;;  %v461_v59 = vmax.f32 %v397_v25, 0.0  ;;  %v462_v60 = vmax.f32 %v398_v26, 0.0  ;;  %485 = vst [vmem:[%s775_s10 + $0x10] sm:$0xff] %v421_v39  ;;  %486 = vst [vmem:[%s775_s10 + $0x18] sm:$0xff] %v422_v40 }
  0x96   : > { %493 = vst [vmem:[%s775_s10 + $0x50] sm:$0xff] %v429_v41  ;;  %494 = vst [vmem:[%s775_s10 + $0x58] sm:$0xff] %v430_v46  ;;  %v469_v61 = vmax.f32 %v405_v27, 0.0  ;;  %v470_v62 = vmax.f32 %v406_v32, 0.0  ;;  %v477_v63 = vmax.f32 %v413_v33, 0.0  ;;  %v478_v0 = vmax.f32 %v414_v34, 0.0 }
  0x97   : > { %501 = vst [vmem:[%s775_s10 + $0x90] sm:$0xff] %v437_v47  ;;  %502 = vst [vmem:[%s775_s10 + $0x98] sm:$0xff] %v438_v48  ;;  %v355_v1 = vadd.f32 %v338_v56, %v721_v28  ;;  %v356_v2 = vadd.f32 %v338_v56, %v723_v29  ;;  %v363_v3 = vadd.f32 %v338_v56, %v725_v30  ;;  %v218_v22 = vld [vmem:[%s700_s7 + $0x138] sm:$0xff]  ;;  %v225_v24 = vld [vmem:[%s700_s7 + $0x170] sm:$0xff] }
  0x98   : > { %509 = vst [vmem:[%s775_s10 + $0xd0] sm:$0xff] %v445_v54  ;;  %510 = vst [vmem:[%s775_s10 + $0xd8] sm:$0xff] %v446_v55  ;;  %v364_v4 = vadd.f32 %v338_v56, %v727_v31  ;;  %v371_v5 = vadd.f32 %v338_v56, %v732_v35  ;;  %v372_v6 = vadd.f32 %v338_v56, %v734_v36  ;;  %v226_v33 = vld [vmem:[%s700_s7 + $0x178] sm:$0xff]  ;;  %v233_v34 = vld [vmem:[%s700_s7 + $0x1b0] sm:$0xff]  ;;  %v353_v55 = vpop.permute.xlu1 %352 }
  0x99   : > { %517 = vst [vmem:[%s775_s10 + $0x110] sm:$0xff] %v453_v57  ;;  %518 = vst [vmem:[%s775_s10 + $0x118] sm:$0xff] %v454_v58  ;;  %v379_v28 = vadd.f32 %v338_v56, %v736_v37  ;;  %v380_v29 = vadd.f32 %v338_v56, %v738_v38  ;;  %v387_v30 = vadd.f32 %v338_v56, %v743_v42  ;;  %v185_v38 = vld [vmem:[%s700_s7 + $0x30] sm:$0xff]  ;;  %v186_v42 = vld [vmem:[%s700_s7 + $0x38] sm:$0xff]  ;;  %v419_v11 = vmax.f32 %v355_v1, 0.0 }
  0x9a   : > { %525 = vst [vmem:[%s775_s10 + $0x150] sm:$0xff] %v461_v59  ;;  %526 = vst [vmem:[%s775_s10 + $0x158] sm:$0xff] %v462_v60  ;;  %v388_v31 = vadd.f32 %v338_v56, %v745_v43  ;;  %v395_v7 = vadd.f32 %v338_v56, %v747_v44  ;;  %v396_v8 = vadd.f32 %v338_v56, %v749_v45  ;;  %v194_v43 = vld [vmem:[%s700_s7 + $0x78] sm:$0xff]  ;;  %v420_v12 = vmax.f32 %v356_v2, 0.0  ;;  %v241_v40 = vld [vmem:[%s700_s7 + $0x1f0] sm:$0xff] }
  0x9b   : > { %533 = vst [vmem:[%s775_s10 + $0x190] sm:$0xff] %v469_v61  ;;  %534 = vst [vmem:[%s775_s10 + $0x198] sm:$0xff] %v470_v62  ;;  %v403_v9 = vadd.f32 %v338_v56, %v754_v49  ;;  %v404_v35 = vadd.f32 %v338_v56, %v756_v50  ;;  %v411_v36 = vadd.f32 %v338_v56, %v758_v51  ;;  %v427_v44 = vmax.f32 %v363_v3, 0.0  ;;  %v201_v49 = vld [vmem:[%s700_s7 + $0xb0] sm:$0xff]  ;;  %v202_v50 = vld [vmem:[%s700_s7 + $0xb8] sm:$0xff] }
  0x9c   : > { %541 = vst [vmem:[%s775_s10 + $0x1d0] sm:$0xff] %v477_v63  ;;  %542 = vst [vmem:[%s775_s10 + $0x1d8] sm:$0xff] %v478_v0  ;;  %v412_v37 = vadd.f32 %v338_v56, %v760_v52  ;;  %v428_v45 = vmax.f32 %v364_v4, 0.0  ;;  %v209_v51 = vld [vmem:[%s700_s7 + $0xf0] sm:$0xff]  ;;  %v435_v52 = vmax.f32 %v371_v5, 0.0  ;;  %v436_v13 = vmax.f32 %v372_v6, 0.0 }
  0x9d   : > { %v443_v14 = vmax.f32 %v379_v28, 0.0  ;;  %v444_v15 = vmax.f32 %v380_v29, 0.0  ;;  %v451_v18 = vmax.f32 %v387_v30, 0.0  ;;  %v452_v19 = vmax.f32 %v388_v31, 0.0  ;;  %483 = vst [vmem:[%s775_s10] sm:$0xff] %v419_v11  ;;  %484 = vst [vmem:[%s775_s10 + $0x8] sm:$0xff] %v420_v12  ;;  %v234_v39 = vld [vmem:[%s700_s7 + $0x1b8] sm:$0xff] }
  0x9e   : > { %v459_v20 = vmax.f32 %v395_v7, 0.0  ;;  %v460_v21 = vmax.f32 %v396_v8, 0.0  ;;  %491 = vst [vmem:[%s775_s10 + $0x40] sm:$0xff] %v427_v44  ;;  %492 = vst [vmem:[%s775_s10 + $0x48] sm:$0xff] %v428_v45  ;;  %v467_v25 = vmax.f32 %v403_v9, 0.0  ;;  %v468_v26 = vmax.f32 %v404_v35, 0.0 }
  0x9f   : > { %v475_v27 = vmax.f32 %v411_v36, 0.0  ;;  %v476_v32 = vmax.f32 %v412_v37, 0.0  ;;  %499 = vst [vmem:[%s775_s10 + $0x80] sm:$0xff] %v435_v52  ;;  %500 = vst [vmem:[%s775_s10 + $0x88] sm:$0xff] %v436_v13  ;;  %v242_v41 = vld [vmem:[%s700_s7 + $0x1f8] sm:$0xff]  ;;  %v273_v46 = vmul.f32 %v762_v53, %v185_v38  ;;  %v274_v47 = vmul.f32 %v762_v53, %v186_v42  ;;  %v191_v11 = vld [vmem:[%s700_s7 + $0x60] sm:$0xff] }
  0xa0   : > { %507 = vst [vmem:[%s775_s10 + $0xc0] sm:$0xff] %v443_v14  ;;  %508 = vst [vmem:[%s775_s10 + $0xc8] sm:$0xff] %v444_v15  ;;  %v281_v48 = vmul.f32 %v762_v53, %v193_v10  ;;  %v282_v54 = vmul.f32 %v762_v53, %v194_v43  ;;  %v289_v56 = vmul.f32 %v762_v53, %v201_v49  ;;  %v183_v10 = vld [vmem:[%s700_s7 + $0x20] sm:$0xff]  ;;  %v184_v43 = vld [vmem:[%s700_s7 + $0x28] sm:$0xff] }
  0xa1   : > { %515 = vst [vmem:[%s775_s10 + $0x100] sm:$0xff] %v451_v18  ;;  %516 = vst [vmem:[%s775_s10 + $0x108] sm:$0xff] %v452_v19  ;;  %v290_v57 = vmul.f32 %v762_v53, %v202_v50  ;;  %v297_v58 = vmul.f32 %v762_v53, %v209_v51  ;;  %v298_v59 = vmul.f32 %v762_v53, %v210_v16  ;;  %v192_v12 = vld [vmem:[%s700_s7 + $0x68] sm:$0xff]  ;;  %v199_v51 = vld [vmem:[%s700_s7 + $0xa0] sm:$0xff] }
  0xa2   : > { %523 = vst [vmem:[%s775_s10 + $0x140] sm:$0xff] %v459_v20  ;;  %524 = vst [vmem:[%s775_s10 + $0x148] sm:$0xff] %v460_v21  ;;  %v305_v60 = vmul.f32 %v762_v53, %v217_v17  ;;  %v306_v61 = vmul.f32 %v762_v53, %v218_v22  ;;  %v313_v62 = vmul.f32 %v762_v53, %v225_v24  ;;  %v200_v52 = vld [vmem:[%s700_s7 + $0xa8] sm:$0xff]  ;;  %v207_v13 = vld [vmem:[%s700_s7 + $0xe0] sm:$0xff] }
  0xa3   : > { %531 = vst [vmem:[%s775_s10 + $0x180] sm:$0xff] %v467_v25  ;;  %532 = vst [vmem:[%s775_s10 + $0x188] sm:$0xff] %v468_v26  ;;  %v314_v63 = vmul.f32 %v762_v53, %v226_v33  ;;  %v321_v0 = vmul.f32 %v762_v53, %v233_v34  ;;  %v322_v1 = vmul.f32 %v762_v53, %v234_v39  ;;  %v208_v18 = vld [vmem:[%s700_s7 + $0xe8] sm:$0xff]  ;;  %v215_v19 = vld [vmem:[%s700_s7 + $0x120] sm:$0xff] }
  0xa4   : > { %539 = vst [vmem:[%s775_s10 + $0x1c0] sm:$0xff] %v475_v27  ;;  %540 = vst [vmem:[%s775_s10 + $0x1c8] sm:$0xff] %v476_v32  ;;  %v329_v2 = vmul.f32 %v762_v53, %v241_v40  ;;  %v330_v3 = vmul.f32 %v762_v53, %v242_v41  ;;  %v361_v4 = vadd.f32 %v353_v55, %v273_v46  ;;  %v216_v25 = vld [vmem:[%s700_s7 + $0x128] sm:$0xff]  ;;  %v223_v26 = vld [vmem:[%s700_s7 + $0x160] sm:$0xff] }
  0xa5   : > { %v362_v5 = vadd.f32 %v353_v55, %v274_v47  ;;  %v369_v6 = vadd.f32 %v353_v55, %v281_v48  ;;  %v370_v28 = vadd.f32 %v353_v55, %v282_v54  ;;  %v377_v29 = vadd.f32 %v353_v55, %v289_v56  ;;  %v224_v39 = vld [vmem:[%s700_s7 + $0x168] sm:$0xff]  ;;  %v231_v40 = vld [vmem:[%s700_s7 + $0x1a0] sm:$0xff] }
  0xa6   : > { %v378_v30 = vadd.f32 %v353_v55, %v290_v57  ;;  %v385_v31 = vadd.f32 %v353_v55, %v297_v58  ;;  %v386_v7 = vadd.f32 %v353_v55, %v298_v59  ;;  %v393_v8 = vadd.f32 %v353_v55, %v305_v60  ;;  %v232_v41 = vld [vmem:[%s700_s7 + $0x1a8] sm:$0xff]  ;;  %v239_v46 = vld [vmem:[%s700_s7 + $0x1e0] sm:$0xff]  ;;  %v348_v57 = vpop.permute.xlu0 %347 }
  0xa7   : > { %v394_v9 = vadd.f32 %v353_v55, %v306_v61  ;;  %v401_v35 = vadd.f32 %v353_v55, %v313_v62  ;;  %v402_v36 = vadd.f32 %v353_v55, %v314_v63  ;;  %v409_v53 = vadd.f32 %v353_v55, %v321_v0  ;;  %v240_v47 = vld [vmem:[%s700_s7 + $0x1e8] sm:$0xff] }
  0xa8   : > { %v410_v37 = vadd.f32 %v353_v55, %v322_v1  ;;  %v417_v38 = vadd.f32 %v353_v55, %v329_v2  ;;  %v418_v42 = vadd.f32 %v353_v55, %v330_v3  ;;  %v425_v44 = vmax.f32 %v361_v4, 0.0 }
  0xa9   : > { %v426_v45 = vmax.f32 %v362_v5, 0.0  ;;  %v433_v49 = vmax.f32 %v369_v6, 0.0  ;;  %v434_v50 = vmax.f32 %v370_v28, 0.0  ;;  %v441_v14 = vmax.f32 %v377_v29, 0.0 }
  0xaa   : > { %v442_v15 = vmax.f32 %v378_v30, 0.0  ;;  %v449_v16 = vmax.f32 %v385_v31, 0.0  ;;  %v450_v17 = vmax.f32 %v386_v7, 0.0  ;;  %v457_v20 = vmax.f32 %v393_v8, 0.0  ;;  %489 = vst [vmem:[%s775_s10 + $0x30] sm:$0xff] %v425_v44 }
  0xab   : > { %v458_v21 = vmax.f32 %v394_v9, 0.0  ;;  %v465_v22 = vmax.f32 %v401_v35, 0.0  ;;  %v466_v24 = vmax.f32 %v402_v36, 0.0  ;;  %490 = vst [vmem:[%s775_s10 + $0x38] sm:$0xff] %v426_v45  ;;  %497 = vst [vmem:[%s775_s10 + $0x70] sm:$0xff] %v433_v49  ;;  %v473_v27 = vmax.f32 %v409_v53, 0.0 }
  0xac   : > { %498 = vst [vmem:[%s775_s10 + $0x78] sm:$0xff] %v434_v50  ;;  %v474_v32 = vmax.f32 %v410_v37, 0.0  ;;  %v481_v33 = vmax.f32 %v417_v38, 0.0  ;;  %v482_v34 = vmax.f32 %v418_v42, 0.0  ;;  %505 = vst [vmem:[%s775_s10 + $0xb0] sm:$0xff] %v441_v14  ;;  %v271_v48 = vmul.f32 %v716_v23, %v183_v10 }
  0xad   : > { %506 = vst [vmem:[%s775_s10 + $0xb8] sm:$0xff] %v442_v15  ;;  %513 = vst [vmem:[%s775_s10 + $0xf0] sm:$0xff] %v449_v16  ;;  %v272_v54 = vmul.f32 %v716_v23, %v184_v43  ;;  %v279_v55 = vmul.f32 %v716_v23, %v191_v11  ;;  %v280_v56 = vmul.f32 %v716_v23, %v192_v12 }
  0xae   : > { %514 = vst [vmem:[%s775_s10 + $0xf8] sm:$0xff] %v450_v17  ;;  %521 = vst [vmem:[%s775_s10 + $0x130] sm:$0xff] %v457_v20  ;;  %v287_v58 = vmul.f32 %v716_v23, %v199_v51  ;;  %v288_v59 = vmul.f32 %v716_v23, %v200_v52  ;;  %v295_v60 = vmul.f32 %v716_v23, %v207_v13 }
  0xaf   : > { %522 = vst [vmem:[%s775_s10 + $0x138] sm:$0xff] %v458_v21  ;;  %529 = vst [vmem:[%s775_s10 + $0x170] sm:$0xff] %v465_v22  ;;  %v296_v61 = vmul.f32 %v716_v23, %v208_v18  ;;  %v303_v62 = vmul.f32 %v716_v23, %v215_v19  ;;  %v304_v63 = vmul.f32 %v716_v23, %v216_v25 }
  0xb0   : > { %530 = vst [vmem:[%s775_s10 + $0x178] sm:$0xff] %v466_v24  ;;  %537 = vst [vmem:[%s775_s10 + $0x1b0] sm:$0xff] %v473_v27  ;;  %v311_v0 = vmul.f32 %v716_v23, %v223_v26  ;;  %v312_v1 = vmul.f32 %v716_v23, %v224_v39  ;;  %v319_v2 = vmul.f32 %v716_v23, %v231_v40 }
  0xb1   : > { %538 = vst [vmem:[%s775_s10 + $0x1b8] sm:$0xff] %v474_v32  ;;  %545 = vst [vmem:[%s775_s10 + $0x1f0] sm:$0xff] %v481_v33  ;;  %v320_v3 = vmul.f32 %v716_v23, %v232_v41  ;;  %v327_v4 = vmul.f32 %v716_v23, %v239_v46  ;;  %v328_v5 = vmul.f32 %v716_v23, %v240_v47 }
  0xb2   : > { %546 = vst [vmem:[%s775_s10 + $0x1f8] sm:$0xff] %v482_v34  ;;  %v359_v6 = vadd.f32 %v348_v57, %v271_v48  ;;  %v360_v28 = vadd.f32 %v348_v57, %v272_v54  ;;  %v367_v29 = vadd.f32 %v348_v57, %v279_v55  ;;  %v368_v30 = vadd.f32 %v348_v57, %v280_v56 }
  0xb3   : > { %v375_v31 = vadd.f32 %v348_v57, %v287_v58  ;;  %v376_v7 = vadd.f32 %v348_v57, %v288_v59  ;;  %v383_v8 = vadd.f32 %v348_v57, %v295_v60  ;;  %v384_v9 = vadd.f32 %v348_v57, %v296_v61 }
  0xb4   : > { %v391_v35 = vadd.f32 %v348_v57, %v303_v62  ;;  %v392_v36 = vadd.f32 %v348_v57, %v304_v63  ;;  %v399_v53 = vadd.f32 %v348_v57, %v311_v0  ;;  %v400_v37 = vadd.f32 %v348_v57, %v312_v1 }
  0xb5   : > { %v407_v38 = vadd.f32 %v348_v57, %v319_v2  ;;  %v408_v42 = vadd.f32 %v348_v57, %v320_v3  ;;  %v415_v10 = vadd.f32 %v348_v57, %v327_v4  ;;  %v416_v43 = vadd.f32 %v348_v57, %v328_v5 }
  0xb6   : > { %v423_v23 = vmax.f32 %v359_v6, 0.0  ;;  %v424_v11 = vmax.f32 %v360_v28, 0.0  ;;  %v431_v12 = vmax.f32 %v367_v29, 0.0  ;;  %v432_v44 = vmax.f32 %v368_v30, 0.0 }
  0xb7   : > { %v439_v45 = vmax.f32 %v375_v31, 0.0  ;;  %v440_v49 = vmax.f32 %v376_v7, 0.0  ;;  %v447_v50 = vmax.f32 %v383_v8, 0.0  ;;  %v448_v51 = vmax.f32 %v384_v9, 0.0 }
  0xb8   : > { %v455_v52 = vmax.f32 %v391_v35, 0.0  ;;  %v456_v13 = vmax.f32 %v392_v36, 0.0  ;;  %v463_v14 = vmax.f32 %v399_v53, 0.0  ;;  %v464_v15 = vmax.f32 %v400_v37, 0.0  ;;  %487 = vst [vmem:[%s775_s10 + $0x20] sm:$0xff] %v423_v23  ;;  %488 = vst [vmem:[%s775_s10 + $0x28] sm:$0xff] %v424_v11 }
  0xb9   : > { %495 = vst [vmem:[%s775_s10 + $0x60] sm:$0xff] %v431_v12  ;;  %496 = vst [vmem:[%s775_s10 + $0x68] sm:$0xff] %v432_v44  ;;  %v471_v16 = vmax.f32 %v407_v38, 0.0  ;;  %v472_v17 = vmax.f32 %v408_v42, 0.0  ;;  %v479_v18 = vmax.f32 %v415_v10, 0.0  ;;  %v480_v19 = vmax.f32 %v416_v43, 0.0 }
  0xba   : > { %503 = vst [vmem:[%s775_s10 + $0xa0] sm:$0xff] %v439_v45  ;;  %504 = vst [vmem:[%s775_s10 + $0xa8] sm:$0xff] %v440_v49 }
  0xbb   : > { %511 = vst [vmem:[%s775_s10 + $0xe0] sm:$0xff] %v447_v50  ;;  %512 = vst [vmem:[%s775_s10 + $0xe8] sm:$0xff] %v448_v51 }
  0xbc   : > { %519 = vst [vmem:[%s775_s10 + $0x120] sm:$0xff] %v455_v52  ;;  %520 = vst [vmem:[%s775_s10 + $0x128] sm:$0xff] %v456_v13 }
  0xbd   : > { %527 = vst [vmem:[%s775_s10 + $0x160] sm:$0xff] %v463_v14  ;;  %528 = vst [vmem:[%s775_s10 + $0x168] sm:$0xff] %v464_v15 }
  0xbe   : > { %535 = vst [vmem:[%s775_s10 + $0x1a0] sm:$0xff] %v471_v16  ;;  %536 = vst [vmem:[%s775_s10 + $0x1a8] sm:$0xff] %v472_v17 }
  0xbf   : > { %543 = vst [vmem:[%s775_s10 + $0x1e0] sm:$0xff] %v479_v18  ;;  %544 = vst [vmem:[%s775_s10 + $0x1e8] sm:$0xff] %v480_v19 }
  0xc0 PF: > { %s13_s12 = sadd.s32 1, %s637_s12  }
  0xc1   : > { %p10_p4 = scmp.ge.s32.totalorder %s13_s12, 4  }
  0xc3   :  { %12 = sbr.rel (!%p10_p4) target bundleno = 1 (0x1), region = 62 }

// kernel: ir_block.5
= control target key start
LH: loop header
LB: loop body
LE: loop exit
PB: predicated region body
PF: predicated region fallthrough
CT: control target
= control target key end

     0   :  { %s1547_s21 = smov 0   ;;  %s2122_s0 = inlined_call_operand.vmem [shape: f32[16,32,256], index: 0, kind: input, shape index: {}]   ;;  %s2123_s1 = inlined_call_operand.vmem [shape: f32[16,32,256], index: 1, kind: input, shape index: {}]   ;;  %s2124_s2 = inlined_call_operand.vmem [shape: f32[32,128], index: 2, kind: input, shape index: {}]   ;;  %s2125_s3 = inlined_call_operand.vmem [shape: f32[1,128], index: 3, kind: input, shape index: {}]   ;;  %s2126_s4 = inlined_call_operand.vmem [shape: f32[128,32], index: 4, kind: input, shape index: {}]   ;;  %s2127_s5 = inlined_call_operand.vmem [shape: f32[1,32], index: 5, kind: input, shape index: {}]   ;;  %s2128_s6 = inlined_call_operand.vmem [shape: f32[16,32,256], index: 6, kind: output, shape index: {}]  }
   0x1 LB: > { %s1345_s22 = sadd.s32 4294967295, %s1507_s21   ;;  %p1349_p0 = scmp.ge.s32.totalorder %s1507_s21, 1  ;;  %s1507_s21 = sphi %s1547_s21, %s16_s21  }
   0x2   : > { %p226_p1 = scmp.lt.s32.totalorder %s1507_s21, 3 }
   0x4   : > { %p227_p2 = pnand %p1349_p0, %p226_p1 }
   0x6   : > { %230 = sbr.rel (%p227_p2) target bundleno = 874 (0x36a), region = 44 }
   0xd   : > { %s1350_s23 = sshll.u32 %s1345_s22, 3  ;;  %vm1510_vm0 = vmmov 0   ;;  %vm531_vm1 = vcmask 130112   ;;  %vm538_vm2 = vcmask 195712   ;;  %vm545_vm3 = vcmask 261312  }
   0xe   : > { %p265_p3 = scmp.lt.s32.totalorder %s1350_s23, 15  ;;  %vm680_vm4 = vcmask 1041409   ;;  %vm682_vm5 = vcmask 1042434   ;;  %vm684_vm6 = vcmask 1043459   ;;  %vm686_vm7 = vcmask 1044484  }
   0xf   : > { %vm688_vm8 = vcmask 1045509   ;;  %vm690_vm9 = vcmask 1046534   ;;  %vm692_vm10 = vcmask 1047559   ;;  %vm694_vm11 = vcmask 261120  }
  0x10   : > { %s2193_s23 = smov (!%p265_p3, %s1350_s23), 15 }
  0x11   : > { %s1555_s24 = sshll.u32 %s2193_s23, 6 }
  0x12   : > { %s1561_s27 = scalar_lea.vmem %s2122_s0, %s1555_s24  ;;  %s1919_s8 = scalar_lea.vmem %s2123_s1, %s1555_s24 }
  0x13   : > { %v1564_v0 = vld [vmem:[%s1561_s27 + $0x40] sm:$0xff]  ;;  %v1567_v1 = vld [vmem:[%s1561_s27 + $0x48] sm:$0xff]  ;;  %v1578_v5 = vld [vmem:[%s1561_s27 + $0x50] sm:$0xff]  ;;  %s1933_s11 = scalar_lea.vmem %s2128_s6, %s1555_s24 }
  0x14   : > { %v1570_v2 = vld [vmem:[%s1561_s27] sm:$0xff]  ;;  %v361_v3 = vadd.f32 %v1567_v1, %v1564_v0  ;;  %v1575_v4 = vld [vmem:[%s1561_s27 + $0x8] sm:$0xff]  ;;  %v1581_v6 = vld [vmem:[%s1561_s27 + $0x58] sm:$0xff] }
  0x15   : > { %v349_v7 = vadd.f32 %v1575_v4, %v1570_v2  ;;  %v1586_v8 = vld [vmem:[%s1561_s27 + $0x10] sm:$0xff]  ;;  %v1589_v9 = vld [vmem:[%s1561_s27 + $0x18] sm:$0xff]  ;;  %v364_v10 = vadd.f32 %v1581_v6, %v1578_v5  ;;  %v1596_v12 = vld [vmem:[%s1561_s27 + $0x60] sm:$0xff] }
  0x16   : > { %362 = vadd.xlane.f32.xlu1 %v361_v3  ;;  %v352_v11 = vadd.f32 %v1589_v9, %v1586_v8  ;;  %v1599_v13 = vld [vmem:[%s1561_s27 + $0x68] sm:$0xff]  ;;  %v1602_v14 = vld [vmem:[%s1561_s27 + $0x20] sm:$0xff]  ;;  %v1612_v18 = vld [vmem:[%s1561_s27 + $0x90] sm:$0xff] }
  0x17   : > { %350 = vadd.xlane.f32.xlu0 %v349_v7  ;;  %v1605_v15 = vld [vmem:[%s1561_s27 + $0x28] sm:$0xff]  ;;  %v367_v16 = vadd.f32 %v1599_v13, %v1596_v12  ;;  %v1615_v19 = vld [vmem:[%s1561_s27 + $0x98] sm:$0xff]  ;;  %v1618_v20 = vld [vmem:[%s1561_s27 + $0x80] sm:$0xff] }
  0x18   : > { %v355_v17 = vadd.f32 %v1605_v15, %v1602_v14  ;;  %v1621_v21 = vld [vmem:[%s1561_s27 + $0x88] sm:$0xff]  ;;  %v376_v22 = vadd.f32 %v1615_v19, %v1612_v18  ;;  %v1628_v24 = vld [vmem:[%s1561_s27 + $0x70] sm:$0xff]  ;;  %v1631_v25 = vld [vmem:[%s1561_s27 + $0x78] sm:$0xff] }
  0x19   : > { %v373_v23 = vadd.f32 %v1621_v21, %v1618_v20  ;;  %v1634_v26 = vld [vmem:[%s1561_s27 + $0x30] sm:$0xff]  ;;  %v1637_v27 = vld [vmem:[%s1561_s27 + $0x38] sm:$0xff]  ;;  %v370_v28 = vadd.f32 %v1631_v25, %v1628_v24  ;;  %v1644_v30 = vld [vmem:[%s1561_s27 + $0xc0] sm:$0xff] }
  0x1a   : > { %365 = vadd.xlane.f32.xlu1 %v364_v10  ;;  %v358_v29 = vadd.f32 %v1637_v27, %v1634_v26  ;;  %v1647_v31 = vld [vmem:[%s1561_s27 + $0xc8] sm:$0xff]  ;;  %v1650_v32 = vld [vmem:[%s1561_s27 + $0xa0] sm:$0xff]  ;;  %v1660_v36 = vld [vmem:[%s1561_s27 + $0xb0] sm:$0xff] }
  0x1b   : > { %353 = vadd.xlane.f32.xlu0 %v352_v11  ;;  %2150 = vst [vmem:[#allocation2_spill] sm:$0xff] %v1647_v31  ;;  %v1653_v33 = vld [vmem:[%s1561_s27 + $0xa8] sm:$0xff]  ;;  %v385_v34 = vadd.f32 %v1647_v31, %v1644_v30  ;;  %2151 = vst [vmem:[#allocation3_spill] sm:$0xff] %v1660_v36  ;;  %v1663_v37 = vld [vmem:[%s1561_s27 + $0xb8] sm:$0xff] }
  0x1c   : > { %v379_v35 = vadd.f32 %v1653_v33, %v1650_v32  ;;  %2152 = vst [vmem:[#allocation4_spill] sm:$0xff] %v1663_v37  ;;  %v1666_v38 = vld [vmem:[%s1561_s27 + $0xd0] sm:$0xff]  ;;  %v1669_v39 = vld [vmem:[%s1561_s27 + $0xd8] sm:$0xff]  ;;  %v382_v40 = vadd.f32 %v1663_v37, %v1660_v36  ;;  %v1676_v42 = vld [vmem:[%s1561_s27 + $0x100] sm:$0xff] }
  0x1d   : > { %2153 = vst [vmem:[#allocation5_spill] sm:$0xff] %v1666_v38  ;;  %2154 = vst [vmem:[#allocation6_spill] sm:$0xff] %v1669_v39  ;;  %v388_v41 = vadd.f32 %v1669_v39, %v1666_v38  ;;  %v1679_v43 = vld [vmem:[%s1561_s27 + $0x108] sm:$0xff]  ;;  %v1682_v44 = vld [vmem:[%s1561_s27 + $0xe0] sm:$0xff] }
  0x1e   : > { %368 = vadd.xlane.f32.xlu1 %v367_v16  ;;  %2155 = vst [vmem:[#allocation7_spill] sm:$0xff] %v1676_v42  ;;  %2156 = vst [vmem:[#allocation8_spill] sm:$0xff] %v1679_v43  ;;  %v1685_v45 = vld [vmem:[%s1561_s27 + $0xe8] sm:$0xff]  ;;  %v397_v46 = vadd.f32 %v1679_v43, %v1676_v42  ;;  %v1692_v48 = vld [vmem:[%s1561_s27 + $0xf0] sm:$0xff] }
  0x1f   : > { %356 = vadd.xlane.f32.xlu0 %v355_v17  ;;  %2157 = vst [vmem:[#allocation9_spill] sm:$0xff] %v1682_v44  ;;  %2158 = vst [vmem:[#allocation10_spill] sm:$0xff] %v1685_v45  ;;  %v391_v47 = vadd.f32 %v1685_v45, %v1682_v44  ;;  %v1695_v49 = vld [vmem:[%s1561_s27 + $0xf8] sm:$0xff]  ;;  %v1698_v50 = vld [vmem:[%s1561_s27 + $0x110] sm:$0xff] }
  0x20   : > { %2159 = vst [vmem:[#allocation11_spill] sm:$0xff] %v1692_v48  ;;  %2160 = vst [vmem:[#allocation12_spill] sm:$0xff] %v1695_v49  ;;  %v1701_v51 = vld [vmem:[%s1561_s27 + $0x118] sm:$0xff]  ;;  %v394_v52 = vadd.f32 %v1695_v49, %v1692_v48  ;;  %v1708_v54 = vld [vmem:[%s1561_s27 + $0x140] sm:$0xff] }
  0x21   : > { %2161 = vst [vmem:[#allocation13_spill] sm:$0xff] %v1698_v50  ;;  %2162 = vst [vmem:[#allocation14_spill] sm:$0xff] %v1701_v51  ;;  %v400_v53 = vadd.f32 %v1701_v51, %v1698_v50  ;;  %v1711_v55 = vld [vmem:[%s1561_s27 + $0x148] sm:$0xff]  ;;  %v1714_v56 = vld [vmem:[%s1561_s27 + $0x120] sm:$0xff] }
  0x22   : > { %377 = vadd.xlane.f32.xlu1 %v376_v22  ;;  %2163 = vst [vmem:[#allocation15_spill] sm:$0xff] %v1708_v54  ;;  %2164 = vst [vmem:[#allocation16_spill] sm:$0xff] %v1711_v55  ;;  %v1717_v57 = vld [vmem:[%s1561_s27 + $0x128] sm:$0xff]  ;;  %v409_v58 = vadd.f32 %v1711_v55, %v1708_v54  ;;  %v1724_v60 = vld [vmem:[%s1561_s27 + $0x130] sm:$0xff] }
  0x23   : > { %374 = vadd.xlane.f32.xlu0 %v373_v23  ;;  %2165 = vst [vmem:[#allocation17_spill] sm:$0xff] %v1714_v56  ;;  %2166 = vst [vmem:[#allocation18_spill] sm:$0xff] %v1717_v57  ;;  %v403_v59 = vadd.f32 %v1717_v57, %v1714_v56  ;;  %v1727_v61 = vld [vmem:[%s1561_s27 + $0x138] sm:$0xff]  ;;  %v327_v62 = vld [vmem:[%s1561_s27 + $0x150] sm:$0xff] }
  0x24   : > { %2167 = vst [vmem:[#allocation19_spill] sm:$0xff] %v1724_v60  ;;  %2168 = vst [vmem:[#allocation20_spill] sm:$0xff] %v1727_v61  ;;  %v328_v63 = vld [vmem:[%s1561_s27 + $0x158] sm:$0xff]  ;;  %v406_v3 = vadd.f32 %v1727_v61, %v1724_v60  ;;  %v333_v10 = vld [vmem:[%s1561_s27 + $0x180] sm:$0xff] }
  0x25   : > { %v412_v7 = vadd.f32 %v328_v63, %v327_v62  ;;  %v334_v11 = vld [vmem:[%s1561_s27 + $0x188] sm:$0xff]  ;;  %v1736_v16 = vld [vmem:[%s1561_s27 + $0x160] sm:$0xff]  ;;  %v339_v62 = vld [vmem:[%s1561_s27 + $0x1b0] sm:$0xff] }
  0x26   : > { %371 = vadd.xlane.f32.xlu1 %v370_v28  ;;  %2169 = vst [vmem:[#allocation21_spill] sm:$0xff] %v1736_v16  ;;  %v1739_v17 = vld [vmem:[%s1561_s27 + $0x168] sm:$0xff]  ;;  %v421_v22 = vadd.f32 %v334_v11, %v333_v10  ;;  %v331_v28 = vld [vmem:[%s1561_s27 + $0x170] sm:$0xff]  ;;  %v340_v63 = vld [vmem:[%s1561_s27 + $0x1b8] sm:$0xff] }
  0x27   : > { %359 = vadd.xlane.f32.xlu0 %v358_v29  ;;  %2170 = vst [vmem:[#allocation22_spill] sm:$0xff] %v1739_v17  ;;  %v415_v23 = vadd.f32 %v1739_v17, %v1736_v16  ;;  %v332_v29 = vld [vmem:[%s1561_s27 + $0x178] sm:$0xff]  ;;  %v430_v10 = vadd.f32 %v340_v63, %v339_v62  ;;  %v768_v62 = vld [vmem:[%s2126_s4] sm:$0xff]  ;;  %v769_v63 = vld [vmem:[%s2126_s4 + $0x8] sm:$0xff] }
  0x2a   : > { %386 = vadd.xlane.f32.xlu1 %v385_v34  ;;  %v335_v34 = vld [vmem:[%s1561_s27 + $0x190] sm:$0xff] }
  0x2b   : > { %380 = vadd.xlane.f32.xlu0 %v379_v35  ;;  %v336_v35 = vld [vmem:[%s1561_s27 + $0x198] sm:$0xff] }
  0x2e   : > { %383 = vadd.xlane.f32.xlu1 %v382_v40  ;;  %v418_v40 = vadd.f32 %v332_v29, %v331_v28  ;;  %v345_v28 = vld [vmem:[%s1561_s27 + $0x1e0] sm:$0xff]  ;;  %v346_v29 = vld [vmem:[%s1561_s27 + $0x1e8] sm:$0xff] }
  0x2f   : > { %389 = vadd.xlane.f32.xlu0 %v388_v41  ;;  %v424_v41 = vadd.f32 %v336_v35, %v335_v34  ;;  %v439_v35 = vadd.f32 %v346_v29, %v345_v28  ;;  %v774_v29 = vld [vmem:[%s2126_s4 + $0x30] sm:$0xff] }
  0x32   : > { %398 = vadd.xlane.f32.xlu1 %v397_v46  ;;  %v341_v46 = vld [vmem:[%s1561_s27 + $0x1c0] sm:$0xff] }
  0x33   : > { %392 = vadd.xlane.f32.xlu0 %v391_v47  ;;  %v342_v47 = vld [vmem:[%s1561_s27 + $0x1c8] sm:$0xff] }
  0x36   : > { %395 = vadd.xlane.f32.xlu1 %v394_v52  ;;  %v337_v52 = vld [vmem:[%s1561_s27 + $0x1a0] sm:$0xff] }
  0x37   : > { %401 = vadd.xlane.f32.xlu0 %v400_v53  ;;  %v338_v53 = vld [vmem:[%s1561_s27 + $0x1a8] sm:$0xff] }
  0x3a   : > { %410 = vadd.xlane.f32.xlu1 %v409_v58  ;;  %v433_v58 = vadd.f32 %v342_v47, %v341_v46  ;;  %v1509_v47 = vmov 0.0|0.0  }
  0x3b   : > { %404 = vadd.xlane.f32.xlu0 %v403_v59  ;;  %v427_v59 = vadd.f32 %v338_v53, %v337_v52  ;;  %1436 = vmatprep.subr.bf16.mxu0 %v1509_v47  ;;  %v479_v52 = vld [vmem:[%s2124_s2 + $0x10] sm:$0xff]  ;;  %v480_v53 = vld [vmem:[%s2124_s2 + $0x18] sm:$0xff] }
  0x3c   : > { %1442 = vmatprep.subr.bf16.mxu1 %v1509_v47 }
  0x3e   : > { %407 = vadd.xlane.f32.xlu1 %v406_v3  ;;  %v343_v3 = vld [vmem:[%s1561_s27 + $0x1d0] sm:$0xff] }
  0x3f   : > { %413 = vadd.xlane.f32.xlu0 %v412_v7  ;;  %v344_v7 = vld [vmem:[%s1561_s27 + $0x1d8] sm:$0xff] }
  0x40   : > { %v436_v11 = vadd.f32 %v344_v7, %v343_v3  ;;  %v770_v3 = vld [vmem:[%s2126_s4 + $0x10] sm:$0xff]  ;;  %v1443_v7 = vpack.c.bf16 %v769_v63, %v768_v62  ;;  %v781_v62 = vld [vmem:[%s2126_s4 + $0x68] sm:$0xff] }
  0x42   : > { %422 = vadd.xlane.f32.xlu1 %v421_v22  ;;  %v347_v22 = vld [vmem:[%s1561_s27 + $0x1f0] sm:$0xff]  ;;  %1444 = vmatpush3.bf16.msra.mxu1 %v1443_v7 }
  0x43   : > { %416 = vadd.xlane.f32.xlu0 %v415_v23  ;;  %v348_v23 = vld [vmem:[%s1561_s27 + $0x1f8] sm:$0xff]  ;;  %1445 = vmatprep.subr.bf16.mxu1 %v1509_v47 }
  0x44   : > { %v442_v34 = vadd.f32 %v348_v23, %v347_v22  ;;  %v772_v22 = vld [vmem:[%s2126_s4 + $0x20] sm:$0xff]  ;;  %v773_v23 = vld [vmem:[%s2126_s4 + $0x28] sm:$0xff] }
  0x45   : > { %v1449_v28 = vpack.c.bf16 %v773_v23, %v772_v22 }
  0x46   : > { %419 = vadd.xlane.f32.xlu1 %v418_v40  ;;  %v477_v40 = vld [vmem:[%s2124_s2] sm:$0xff] }
  0x47   : > { %425 = vadd.xlane.f32.xlu0 %v424_v41  ;;  %v478_v41 = vld [vmem:[%s2124_s2 + $0x8] sm:$0xff] }
  0x48   : > { %v1437_v46 = vpack.c.bf16 %v478_v41, %v477_v40  ;;  %v776_v40 = vld [vmem:[%s2126_s4 + $0x40] sm:$0xff]  ;;  %v777_v41 = vld [vmem:[%s2126_s4 + $0x48] sm:$0xff] }
  0x4a   : > { %434 = vadd.xlane.f32.xlu1 %v433_v58  ;;  %1438 = vmatpush3.bf16.msra.mxu0 %v1437_v46  ;;  %v1440_v58 = vpack.c.bf16 %v480_v53, %v479_v52  ;;  %v1455_v46 = vpack.c.bf16 %v777_v41, %v776_v40  ;;  %v778_v52 = vld [vmem:[%s2126_s4 + $0x50] sm:$0xff]  ;;  %v779_v53 = vld [vmem:[%s2126_s4 + $0x58] sm:$0xff] }
  0x4b   : > { %428 = vadd.xlane.f32.xlu0 %v427_v59  ;;  %1439 = vmatprep.subr.bf16.mxu0 %v1509_v47  ;;  %v1511_v59 = vmov 0.0  }
  0x4c   : > { %1398 = vmatprep.mubr.msk.f32.mxu0 %vm1510_vm0, %v1511_v59  ;;  %1433 = vmatprep.mubr.msk.f32.mxu1 %vm1510_vm0, %v1511_v59  ;;  %v780_v59 = vld [vmem:[%s2126_s4 + $0x60] sm:$0xff] }
  0x4d   : > { %v1461_v63 = vpack.c.bf16 %v781_v62, %v780_v59 }
  0x4e   : > { %431 = vadd.xlane.f32.xlu1 %v430_v10  ;;  %1441 = vmatpush3.bf16.msra.mxu0 %v1440_v58  ;;  %v771_v10 = vld [vmem:[%s2126_s4 + $0x18] sm:$0xff]  ;;  %v1458_v58 = vpack.c.bf16 %v779_v53, %v778_v52 }
  0x4f   : > { %437 = vadd.xlane.f32.xlu0 %v436_v11  ;;  %v1446_v11 = vpack.c.bf16 %v771_v10, %v770_v3 }
  0x51   : > { %1447 = vmatpush3.bf16.msra.mxu1 %v1446_v11 }
  0x52   : > { %443 = vadd.xlane.f32.xlu1 %v442_v34  ;;  %1448 = vmatprep.subr.bf16.mxu1 %v1509_v47  ;;  %v775_v34 = vld [vmem:[%s2126_s4 + $0x38] sm:$0xff] }
  0x53   : > { %440 = vadd.xlane.f32.xlu0 %v439_v35  ;;  %v1452_v35 = vpack.c.bf16 %v775_v34, %v774_v29 }
  0x55   : > { %1450 = vmatpush3.bf16.msra.mxu1 %v1449_v28 }
  0x56   : > { %1451 = vmatprep.subr.bf16.mxu1 %v1509_v47 }
  0x59   : > { %1453 = vmatpush3.bf16.msra.mxu1 %v1452_v35 }
  0x5a   : > { %1454 = vmatprep.subr.bf16.mxu1 %v1509_v47 }
  0x5d   : > { %1456 = vmatpush3.bf16.msra.mxu1 %v1455_v46 }
  0x5e   : > { %1457 = vmatprep.subr.bf16.mxu1 %v1509_v47 }
  0x61   : > { %1459 = vmatpush3.bf16.msra.mxu1 %v1458_v58  ;;  %v520_v58 = vlaneseq }
  0x62   : > { %1460 = vmatprep.subr.bf16.mxu1 %v1509_v47 }
  0x63   : > { %v1817_v17 = vshrl.u32 %v520_v58, 7 }
  0x65   : > { %1462 = vmatpush3.bf16.msra.mxu1 %v1461_v63 }
  0x66   : > { %1463 = vmatprep.subr.bf16.mxu1 %v1509_v47  ;;  %v521_v47 = vand.u32 127, %v520_v58 }
  0x68   : > { %v526_v16 = vadd.s32 4294967288, %v521_v47  ;;  %v533_v61 = vadd.s32 4294967280, %v521_v47  ;;  %v540_v55 = vadd.s32 4294967272, %v521_v47  ;;  %v1822_v51 = vsub.s32 %v521_v47, %v1817_v17 }
  0x6a   : > { %v1825_v57 = vsub.s32 %v526_v16, %v1817_v17  ;;  %v1828_v43 = vsub.s32 %v533_v61, %v1817_v17  ;;  %v1831_v44 = vsub.s32 %v540_v55, %v1817_v17 }
  0xa3   : > { %v363_v3 = vpop.xlane.xlu1 %362 }
  0xa4   : > { %v351_v7 = vpop.xlane.xlu0 %350  ;;  %v449_v50 = vmul.f32 0.0051020407, %v363_v3 }
  0xa5   : > { %v445_v45 = vmul.f32 0.0051020407, %v351_v7 }
  0xa7   : > { %v366_v10 = vpop.xlane.xlu1 %365 }
  0xa8   : > { %v354_v11 = vpop.xlane.xlu0 %353  ;;  %v450_v56 = vmul.f32 0.0051020407, %v366_v10 }
  0xa9   : > { %v446_v49 = vmul.f32 0.0051020407, %v354_v11 }
  0xaa   : > { %v554_v10 = vrot.slane %v450_v56, %v1825_v57 }
  0xab   : > { %v369_v22 = vpop.xlane.xlu1 %368  ;;  %v530_v11 = vrot.slane %v446_v49, %v1825_v57 }
  0xac   : > { %v357_v23 = vpop.xlane.xlu0 %356  ;;  %v451_v48 = vmul.f32 0.0051020407, %v369_v22 }
  0xad   : > { %v447_v58 = vmul.f32 0.0051020407, %v357_v23 }
  0xae   : > { %v559_v22 = vrot.slane %v451_v48, %v1828_v43 }
  0xaf   : > { %v378_v28 = vpop.xlane.xlu1 %377  ;;  %v537_v23 = vrot.slane %v447_v58, %v1828_v43 }
  0xb0   : > { %v375_v29 = vpop.xlane.xlu0 %374  ;;  %v454_v42 = vmul.f32 0.0051020407, %v378_v28 }
  0xb1   : > { %v453_v39 = vmul.f32 0.0051020407, %v375_v29  ;;  %v550_v29 = vrot.slane %v449_v50, %v1822_v51 }
  0xb2   : > { %v573_v7 = vrot.slane %v454_v42, %v1825_v57 }
  0xb3   : > { %v372_v34 = vpop.xlane.xlu1 %371  ;;  %v569_v55 = vrot.slane %v453_v39, %v1822_v51  ;;  %v555_v48 = vsel %vm531_vm1, %v554_v10, %v550_v29 }
  0xb4   : > { %v360_v35 = vpop.xlane.xlu0 %359  ;;  %v452_v47 = vmul.f32 0.0051020407, %v372_v34  ;;  %v525_v34 = vrot.slane %v445_v45, %v1822_v51  ;;  %v560_v58 = vsel %vm538_vm2, %v559_v22, %v555_v48 }
  0xb5   : > { %v448_v37 = vmul.f32 0.0051020407, %v360_v35  ;;  %v574_v45 = vsel %vm531_vm1, %v573_v7, %v569_v55 }
  0xb6   : > { %v564_v35 = vrot.slane %v452_v47, %v1831_v44 }
  0xb7   : > { %v387_v40 = vpop.xlane.xlu1 %386  ;;  %v544_v56 = vrot.slane %v448_v37, %v1831_v44 }
  0xb8   : > { %v381_v41 = vpop.xlane.xlu0 %380  ;;  %v565_v37 = vsel %vm545_vm3, %v564_v35, %v560_v58 }
  0xb9   : > { %v455_v16 = vmul.f32 0.0051020407, %v381_v41 }
  0xbb   : > { %v384_v46 = vpop.xlane.xlu1 %383  ;;  %v578_v41 = vrot.slane %v455_v16, %v1828_v43  ;;  %v457_v16 = vmul.f32 0.0051020407, %v387_v40 }
  0xbc   : > { %v390_v52 = vpop.xlane.xlu0 %389  ;;  %v456_v61 = vmul.f32 0.0051020407, %v384_v46  ;;  %v532_v46 = vsel %vm531_vm1, %v530_v11, %v525_v34 }
  0xbd   : > { %v458_v39 = vmul.f32 0.0051020407, %v390_v52  ;;  %v539_v50 = vsel %vm538_vm2, %v537_v23, %v532_v46  ;;  %v579_v11 = vsel %vm538_vm2, %v578_v41, %v574_v45  ;;  %v588_v34 = vrot.slane %v457_v16, %v1822_v51 }
  0xbe   : > { %v583_v42 = vrot.slane %v456_v61, %v1831_v44  ;;  %v546_v36 = vsel %vm545_vm3, %v544_v56, %v539_v50 }
  0xbf   : > { %v1813_v53 = vpop.xlane.xlu1 %398  ;;  %v592_v61 = vrot.slane %v458_v39, %v1825_v57  ;;  %v681_v22 = vsel %vm680_vm4, %v565_v37, %v546_v36 }
  0xc0   : > { %v393_v59 = vpop.xlane.xlu0 %392  ;;  %v584_v52 = vsel %vm545_vm3, %v583_v42, %v579_v11  ;;  %v461_v23 = vmul.f32 0.0051020407, %v1813_v53 }
  0xc1   : > { %v459_v31 = vmul.f32 0.0051020407, %v393_v59  ;;  %v683_v41 = vsel %vm682_vm5, %v584_v52, %v681_v22  ;;  %v593_v36 = vsel %vm531_vm1, %v592_v61, %v588_v34 }
  0xc2   : > { %v607_v39 = vrot.slane %v461_v23, %v1822_v51 }
  0xc3   : > { %v1815_v62 = vpop.xlane.xlu1 %395  ;;  %v597_v40 = vrot.slane %v459_v31, %v1828_v43 }
  0xc4   : > { %v402_v63 = vpop.xlane.xlu0 %401  ;;  %v460_v7 = vmul.f32 0.0051020407, %v1815_v62 }
  0xc5   : > { %v462_v55 = vmul.f32 0.0051020407, %v402_v63  ;;  %v598_v50 = vsel %vm538_vm2, %v597_v40, %v593_v36 }
  0xc6   : > { %v602_v31 = vrot.slane %v460_v7, %v1831_v44 }
  0xc7   : > { %v1819_v60 = vpop.xlane.xlu1 %410 }
  0xc8   : > { %v405_v54 = vpop.xlane.xlu0 %404  ;;  %v465_v53 = vmul.f32 0.0051020407, %v1819_v60  ;;  %v603_v22 = vsel %vm545_vm3, %v602_v31, %v598_v50 }
  0xc9   : > { %v463_v59 = vmul.f32 0.0051020407, %v405_v54  ;;  %v611_v54 = vrot.slane %v462_v55, %v1825_v57  ;;  %v685_v31 = vsel %vm684_vm6, %v603_v22, %v683_v41  ;;  %v783_v41 = vld [vmem:[%s2126_s4 + $0x78] sm:$0xff] }
  0xca   : > { %v626_v11 = vrot.slane %v465_v53, %v1822_v51 }
  0xcb   : > { %v408_v38 = vpop.xlane.xlu1 %407  ;;  %v612_v23 = vsel %vm531_vm1, %v611_v54, %v607_v39 }
  0xcc   : > { %v414_v3 = vpop.xlane.xlu0 %413  ;;  %v464_v48 = vmul.f32 0.0051020407, %v408_v38  ;;  %v616_v38 = vrot.slane %v463_v59, %v1828_v43 }
  0xcd   : > { %v466_v35 = vmul.f32 0.0051020407, %v414_v3 }
  0xce   : > { %v621_v60 = vrot.slane %v464_v48, %v1831_v44  ;;  %v617_v40 = vsel %vm538_vm2, %v616_v38, %v612_v23 }
  0xcf   : > { %v423_v28 = vpop.xlane.xlu1 %422 }
  0xd0   : > { %v417_v49 = vpop.xlane.xlu0 %416  ;;  %v469_v3 = vmul.f32 0.0051020407, %v423_v28 }
  0xd1   : > { %v467_v46 = vmul.f32 0.0051020407, %v417_v49  ;;  %v630_v49 = vrot.slane %v466_v35, %v1825_v57 }
  0xd2   : > { %v645_v7 = vrot.slane %v469_v3, %v1822_v51 }
  0xd3   : > { %v420_v47 = vpop.xlane.xlu1 %419  ;;  %v631_v59 = vsel %vm531_vm1, %v630_v49, %v626_v11  ;;  %v1361_v11 = vld [vmem:[%s2127_s5] ss:$0 sm:$0xff] }
  0xd4   : > { %v426_v10 = vpop.xlane.xlu0 %425  ;;  %v468_v62 = vmul.f32 0.0051020407, %v420_v47  ;;  %v635_v47 = vrot.slane %v467_v46, %v1828_v43 }
  0xd5   : > { %v470_v42 = vmul.f32 0.0051020407, %v426_v10 }
  0xd6   : > { %v640_v28 = vrot.slane %v468_v62, %v1831_v44  ;;  %v636_v46 = vsel %vm538_vm2, %v635_v47, %v631_v59  ;;  %v888_v59 = vsub.s32 1, %v1817_v17 }
  0xd7   : > { %v435_v29 = vpop.xlane.xlu1 %434  ;;  %v649_v16 = vrot.slane %v470_v42, %v1825_v57 }
  0xd8   : > { %v429_v56 = vpop.xlane.xlu0 %428  ;;  %v473_v52 = vmul.f32 0.0051020407, %v435_v29  ;;  %v622_v29 = vsel %vm545_vm3, %v621_v60, %v617_v40  ;;  %v641_v53 = vsel %vm545_vm3, %v640_v28, %v636_v46 }
  0xd9   : > { %v471_v63 = vmul.f32 0.0051020407, %v429_v56  ;;  %v650_v42 = vsel %vm531_vm1, %v649_v16, %v645_v7  ;;  %v687_v3 = vsel %vm686_vm7, %v622_v29, %v685_v31  ;;  %v926_v29 = vsub.s32 3, %v1817_v17 }
  0xda   : > { %v664_v62 = vrot.slane %v473_v52, %v1822_v51  ;;  %v689_v51 = vsel %vm688_vm8, %v641_v53, %v687_v3  ;;  %v964_v53 = vsub.s32 5, %v1817_v17  ;;  %v1002_v31 = vsub.s32 7, %v1817_v17 }
  0xdb   : > { %v432_v58 = vpop.xlane.xlu1 %431  ;;  %v654_v61 = vrot.slane %v471_v63, %v1828_v43 }
  0xdc   : > { %v472_v45 = vmul.f32 0.0051020407, %v432_v58  ;;  %v438_v37 = vpop.xlane.xlu0 %437 }
  0xdd   : > { %v474_v10 = vmul.f32 0.0051020407, %v438_v37  ;;  %v655_v63 = vsel %vm538_vm2, %v654_v61, %v650_v42  ;;  %v1359_v37 = vld [vmem:[%s2125_s3] ss:$0 sm:$0xff]  ;;  %v945_v42 = vsub.s32 4, %v1817_v17 }
  0xde   : > { %v659_v55 = vrot.slane %v472_v45, %v1831_v44 }
  0xdf   : > { %v444_v34 = vpop.xlane.xlu1 %443  ;;  %v668_v35 = vrot.slane %v474_v10, %v1825_v57 }
  0xe0   : > { %v441_v56 = vpop.xlane.xlu0 %440  ;;  %v476_v48 = vmul.f32 0.0051020407, %v444_v34  ;;  %v660_v57 = vsel %vm545_vm3, %v659_v55, %v655_v63  ;;  %v869_v55 = vsub.s32 0, %v1817_v17  ;;  %v983_v63 = vsub.s32 6, %v1817_v17 }
  0xe1   : > { %v475_v36 = vmul.f32 0.0051020407, %v441_v56  ;;  %v669_v58 = vsel %vm531_vm1, %v668_v35, %v664_v62  ;;  %v907_v56 = vsub.s32 2, %v1817_v17  ;;  %v1085_v17 = vld [vmem:[%s1919_s8 + $0x10] sm:$0xff] }
  0xe2   : > { %v678_v39 = vrot.slane %v476_v48, %v1831_v44  ;;  %v691_v44 = vsel %vm690_vm9, %v660_v57, %v689_v51 }
  0xe3   : > { %v673_v54 = vrot.slane %v475_v36, %v1828_v43  ;;  %v782_v43 = vld [vmem:[%s2126_s4 + $0x70] sm:$0xff] }
  0xe4   : > { %v1464_v45 = vpack.c.bf16 %v783_v41, %v782_v43 }
  0xe5   : > { %v674_v50 = vsel %vm538_vm2, %v673_v54, %v669_v58  ;;  %v1086_v54 = vld [vmem:[%s1919_s8 + $0x18] sm:$0xff]  ;;  %v1083_v58 = vld [vmem:[%s1919_s8] sm:$0xff] }
  0xe6   : > { %v679_v38 = vsel %vm545_vm3, %v678_v39, %v674_v50  ;;  %1465 = vmatpush3.bf16.msra.mxu1 %v1464_v45  ;;  %v1084_v50 = vld [vmem:[%s1919_s8 + $0x8] sm:$0xff] }
  0xe7   : > { %v693_v49 = vsel %vm692_vm10, %v679_v38, %v691_v44 }
  0xe8   : > { %1399 = vmatmul.mubr.msk.f32.vlgmr.msra.gmra.mrb[0].mxu0 %vm694_vm11, %v693_v49 }
 0x1bb   : > { %v763_v60 = vpop.f32.mrb[0].mxu0 }
 0x1bc   : > { %v764_v47 = vadd.f32 %v1359_v37, %v763_v60  ;;  %v1400_v16 = vpop.f32.mrb[1].mxu0 }
 0x1be   : > { %v767_v10 = vmax.f32 %v764_v47, 0.0  ;;  %v1088_v47 = vld [vmem:[%s1919_s8 + $0x28] sm:$0xff] }
 0x1c0   : > { %1434 = vmatmul.mubr.f32.vlgmr.msra.gmra.mrb[0].mxu1 %v767_v10 }
 0x293   : > { %v857_v28 = vpop.f32.mrb[0].mxu1 }
 0x294   : > { %v858_v52 = vadd.f32 %v1361_v11, %v857_v28  ;;  %v1435_v61 = vpop.f32.mrb[1].mxu1 }
 0x296   : > { %v1362_v22 = vmul.f32 -1.442695, %v858_v52 }
 0x298   : > { %1477 = vpow2.f32 %v1362_v22 }
 0x2a2   : > { %v1478_v23 = vpop.eup %1477 }
 0x2a3   : > { %v864_v7 = vadd.f32 1.0, %v1478_v23 }
 0x2a5   : > { %1479 = vrcp.f32 %v864_v7 }
 0x2af   : > { %v1480_v34 = vpop.eup %1479 }
 0x2b0   : > { %v870_v40 = vrot.slane %v1480_v34, %v869_v55  ;;  %v889_v35 = vrot.slane %v1480_v34, %v888_v59  ;;  %v908_v48 = vrot.slane %v1480_v34, %v907_v56  ;;  %v927_v46 = vrot.slane %v1480_v34, %v926_v29  ;;  %v1089_v55 = vld [vmem:[%s1919_s8 + $0x30] sm:$0xff]  ;;  %v1095_v59 = vld [vmem:[%s1919_s8 + $0x60] sm:$0xff] }
 0x2b1   : > { %v946_v36 = vrot.slane %v1480_v34, %v945_v42  ;;  %v965_v62 = vrot.slane %v1480_v34, %v964_v53  ;;  %v984_v39 = vrot.slane %v1480_v34, %v983_v63  ;;  %v1003_v57 = vrot.slane %v1480_v34, %v1002_v31  ;;  %v1090_v34 = vld [vmem:[%s1919_s8 + $0x38] sm:$0xff]  ;;  %v1099_v63 = vld [vmem:[%s1919_s8 + $0x80] sm:$0xff] }
 0x2b2   : > { %876 = vbcast.lane.b32.xlu1 %v870_v40, 264  ;;  %872 = vbcast.lane.b32.xlu0 %v870_v40, 256  ;;  %v1094_v53 = vld [vmem:[%s1919_s8 + $0x58] sm:$0xff] }
 0x2b6   : > { %880 = vbcast.lane.b32.xlu1 %v870_v40, 272  ;;  %891 = vbcast.lane.b32.xlu0 %v889_v35, 256 }
 0x2ba   : > { %884 = vbcast.lane.b32.xlu1 %v870_v40, 280  ;;  %899 = vbcast.lane.b32.xlu0 %v889_v35, 272 }
 0x2be   : > { %895 = vbcast.lane.b32.xlu1 %v889_v35, 264  ;;  %910 = vbcast.lane.b32.xlu0 %v908_v48, 256 }
 0x2c2   : > { %903 = vbcast.lane.b32.xlu1 %v889_v35, 280  ;;  %918 = vbcast.lane.b32.xlu0 %v908_v48, 272  ;;  %v1096_v35 = vld [vmem:[%s1919_s8 + $0x68] sm:$0xff] }
 0x2c6   : > { %914 = vbcast.lane.b32.xlu1 %v908_v48, 264  ;;  %929 = vbcast.lane.b32.xlu0 %v927_v46, 256 }
 0x2ca   : > { %922 = vbcast.lane.b32.xlu1 %v908_v48, 280  ;;  %937 = vbcast.lane.b32.xlu0 %v927_v46, 272 }
 0x2ce   : > { %933 = vbcast.lane.b32.xlu1 %v927_v46, 264  ;;  %948 = vbcast.lane.b32.xlu0 %v946_v36, 256 }
 0x2d2   : > { %941 = vbcast.lane.b32.xlu1 %v927_v46, 280  ;;  %956 = vbcast.lane.b32.xlu0 %v946_v36, 272 }
 0x2d6   : > { %952 = vbcast.lane.b32.xlu1 %v946_v36, 264  ;;  %967 = vbcast.lane.b32.xlu0 %v965_v62, 256 }
 0x2da   : > { %960 = vbcast.lane.b32.xlu1 %v946_v36, 280  ;;  %975 = vbcast.lane.b32.xlu0 %v965_v62, 272  ;;  %v1093_v36 = vld [vmem:[%s1919_s8 + $0x50] sm:$0xff] }
 0x2de   : > { %971 = vbcast.lane.b32.xlu1 %v965_v62, 264  ;;  %986 = vbcast.lane.b32.xlu0 %v984_v39, 256 }
 0x2e2   : > { %979 = vbcast.lane.b32.xlu1 %v965_v62, 280  ;;  %994 = vbcast.lane.b32.xlu0 %v984_v39, 272 }
 0x2e6   : > { %990 = vbcast.lane.b32.xlu1 %v984_v39, 264  ;;  %1005 = vbcast.lane.b32.xlu0 %v1003_v57, 256 }
 0x2ea   : > { %998 = vbcast.lane.b32.xlu1 %v984_v39, 280  ;;  %1013 = vbcast.lane.b32.xlu0 %v1003_v57, 272  ;;  %v1100_v39 = vld [vmem:[%s1919_s8 + $0x88] sm:$0xff] }
 0x2ee   : > { %1009 = vbcast.lane.b32.xlu1 %v1003_v57, 264 }
 0x2f2   : > { %1017 = vbcast.lane.b32.xlu1 %v1003_v57, 280 }
 0x324   : > { %v877_v3 = vpop.permute.xlu1 %876  ;;  %v873_v51 = vpop.permute.xlu0 %872 }
 0x325   : > { %v1021_v38 = vmul.f32 %v877_v3, %v1586_v8  ;;  %v1022_v44 = vmul.f32 %v877_v3, %v1589_v9  ;;  %v1019_v49 = vmul.f32 %v873_v51, %v1570_v2  ;;  %v1020_v43 = vmul.f32 %v873_v51, %v1575_v4  ;;  %v1087_v8 = vld [vmem:[%s1919_s8 + $0x20] sm:$0xff]  ;;  %v1092_v4 = vld [vmem:[%s1919_s8 + $0x48] sm:$0xff] }
 0x326   : > { %v1091_v2 = vld [vmem:[%s1919_s8 + $0x40] sm:$0xff] }
 0x327   : > { %v1149_v41 = vadd.f32 %v1085_v17, %v1021_v38  ;;  %v1150_v45 = vadd.f32 %v1086_v54, %v1022_v44  ;;  %v1147_v37 = vadd.f32 %v1083_v58, %v1019_v49  ;;  %v1148_v60 = vadd.f32 %v1084_v50, %v1020_v43  ;;  %v1097_v58 = vld [vmem:[%s1919_s8 + $0x70] sm:$0xff]  ;;  %v1098_v50 = vld [vmem:[%s1919_s8 + $0x78] sm:$0xff]  ;;  %v1103_v38 = vld [vmem:[%s1919_s8 + $0xa0] sm:$0xff] }
 0x328   : > { %v881_v9 = vpop.permute.xlu1 %880  ;;  %v892_v16 = vpop.permute.xlu0 %891  ;;  %v1104_v44 = vld [vmem:[%s1919_s8 + $0xa8] sm:$0xff] }
 0x329   : > { %1213 = vst [vmem:[%s1933_s11 + $0x10] sm:$0xff] %v1149_v41  ;;  %1214 = vst [vmem:[%s1933_s11 + $0x18] sm:$0xff] %v1150_v45  ;;  %v1023_v10 = vmul.f32 %v881_v9, %v1602_v14  ;;  %v1024_v11 = vmul.f32 %v881_v9, %v1605_v15  ;;  %v1027_v28 = vmul.f32 %v892_v16, %v1564_v0  ;;  %v1107_v9 = vld [vmem:[%s1919_s8 + $0xc0] sm:$0xff] }
 0x32a   : > { %1211 = vst [vmem:[%s1933_s11] sm:$0xff] %v1147_v37  ;;  %1212 = vst [vmem:[%s1933_s11 + $0x8] sm:$0xff] %v1148_v60  ;;  %v1028_v52 = vmul.f32 %v892_v16, %v1567_v1  ;;  %v1101_v60 = vld [vmem:[%s1919_s8 + $0x90] sm:$0xff] }
 0x32b   : > { %v1151_v61 = vadd.f32 %v1087_v8, %v1023_v10  ;;  %v1152_v22 = vadd.f32 %v1088_v47, %v1024_v11  ;;  %v1155_v23 = vadd.f32 %v1091_v2, %v1027_v28  ;;  %v1102_v8 = vld [vmem:[%s1919_s8 + $0x98] sm:$0xff]  ;;  %v1108_v2 = vld [vmem:[%s1919_s8 + $0xc8] sm:$0xff] }
 0x32c   : > { %v1156_v7 = vadd.f32 %v1092_v4, %v1028_v52  ;;  %v885_v40 = vpop.permute.xlu1 %884  ;;  %v900_v14 = vpop.permute.xlu0 %899  ;;  %v2171_v4 = vld [vmem:[#allocation2_spill] sm:$0xff] }
 0x32d   : > { %1215 = vst [vmem:[%s1933_s11 + $0x20] sm:$0xff] %v1151_v61  ;;  %1216 = vst [vmem:[%s1933_s11 + $0x28] sm:$0xff] %v1152_v22  ;;  %v1025_v0 = vmul.f32 %v885_v40, %v1634_v26  ;;  %v1026_v1 = vmul.f32 %v885_v40, %v1637_v27  ;;  %v1031_v15 = vmul.f32 %v900_v14, %v1596_v12  ;;  %v1105_v61 = vld [vmem:[%s1919_s8 + $0xb0] sm:$0xff]  ;;  %v1106_v22 = vld [vmem:[%s1919_s8 + $0xb8] sm:$0xff] }
 0x32e   : > { %1219 = vst [vmem:[%s1933_s11 + $0x40] sm:$0xff] %v1155_v23  ;;  %1220 = vst [vmem:[%s1933_s11 + $0x48] sm:$0xff] %v1156_v7  ;;  %v1032_v56 = vmul.f32 %v900_v14, %v1599_v13  ;;  %v1111_v7 = vld [vmem:[%s1919_s8 + $0xe0] sm:$0xff] }
 0x32f   : > { %v1153_v48 = vadd.f32 %v1089_v55, %v1025_v0  ;;  %v1154_v29 = vadd.f32 %v1090_v34, %v1026_v1  ;;  %v1159_v46 = vadd.f32 %v1095_v59, %v1031_v15  ;;  %v1112_v55 = vld [vmem:[%s1919_s8 + $0xe8] sm:$0xff]  ;;  %v2173_v34 = vld [vmem:[#allocation4_spill] sm:$0xff]  ;;  %v2174_v59 = vld [vmem:[#allocation9_spill] sm:$0xff] }
 0x330   : > { %v1160_v42 = vadd.f32 %v1096_v35, %v1032_v56  ;;  %v896_v62 = vpop.permute.xlu1 %895  ;;  %v911_v26 = vpop.permute.xlu0 %910  ;;  %v2175_v14 = vld [vmem:[#allocation10_spill] sm:$0xff] }
 0x331   : > { %1217 = vst [vmem:[%s1933_s11 + $0x30] sm:$0xff] %v1153_v48  ;;  %1218 = vst [vmem:[%s1933_s11 + $0x38] sm:$0xff] %v1154_v29  ;;  %v1029_v12 = vmul.f32 %v896_v62, %v1578_v5  ;;  %v1030_v13 = vmul.f32 %v896_v62, %v1581_v6  ;;  %v1035_v27 = vmul.f32 %v911_v26, %v1618_v20  ;;  %v1109_v29 = vld [vmem:[%s1919_s8 + $0xd0] sm:$0xff] }
 0x332   : > { %1223 = vst [vmem:[%s1933_s11 + $0x60] sm:$0xff] %v1159_v46  ;;  %1224 = vst [vmem:[%s1933_s11 + $0x68] sm:$0xff] %v1160_v42  ;;  %v1036_v31 = vmul.f32 %v911_v26, %v1621_v21  ;;  %v1110_v46 = vld [vmem:[%s1919_s8 + $0xd8] sm:$0xff]  ;;  %v2177_v26 = vld [vmem:[#allocation6_spill] sm:$0xff] }
 0x333   : > { %v1157_v57 = vadd.f32 %v1093_v36, %v1029_v12  ;;  %v1158_v17 = vadd.f32 %v1094_v53, %v1030_v13  ;;  %v1163_v54 = vadd.f32 %v1099_v63, %v1035_v27  ;;  %v1115_v36 = vld [vmem:[%s1919_s8 + $0x100] sm:$0xff]  ;;  %v1116_v53 = vld [vmem:[%s1919_s8 + $0x108] sm:$0xff]  ;;  %v2176_v63 = vld [vmem:[#allocation5_spill] sm:$0xff] }
 0x334   : > { %v1164_v3 = vadd.f32 %v1100_v39, %v1036_v31  ;;  %v904_v51 = vpop.permute.xlu1 %903  ;;  %v919_v5 = vpop.permute.xlu0 %918  ;;  %v2178_v13 = vld [vmem:[#allocation7_spill] sm:$0xff]  ;;  %v2179_v31 = vld [vmem:[#allocation8_spill] sm:$0xff] }
 0x335   : > { %1221 = vst [vmem:[%s1933_s11 + $0x50] sm:$0xff] %v1157_v57  ;;  %1222 = vst [vmem:[%s1933_s11 + $0x58] sm:$0xff] %v1158_v17  ;;  %v1033_v6 = vmul.f32 %v904_v51, %v1628_v24  ;;  %v1034_v20 = vmul.f32 %v904_v51, %v1631_v25  ;;  %v1039_v21 = vmul.f32 %v919_v5, %v1650_v32  ;;  %v1114_v51 = vld [vmem:[%s1919_s8 + $0xf8] sm:$0xff] }
 0x336   : > { %1227 = vst [vmem:[%s1933_s11 + $0x80] sm:$0xff] %v1163_v54  ;;  %1228 = vst [vmem:[%s1933_s11 + $0x88] sm:$0xff] %v1164_v3  ;;  %v1040_v49 = vmul.f32 %v919_v5, %v1653_v33  ;;  %v1120_v5 = vld [vmem:[%s1919_s8 + $0x128] sm:$0xff] }
 0x337   : > { %v1161_v43 = vadd.f32 %v1097_v58, %v1033_v6  ;;  %v1162_v41 = vadd.f32 %v1098_v50, %v1034_v20  ;;  %v1167_v45 = vadd.f32 %v1103_v38, %v1039_v21  ;;  %v1113_v50 = vld [vmem:[%s1919_s8 + $0xf0] sm:$0xff]  ;;  %v2180_v20 = vld [vmem:[#allocation11_spill] sm:$0xff] }
 0x338   : > { %v1168_v37 = vadd.f32 %v1104_v44, %v1040_v49  ;;  %v915_v47 = vpop.permute.xlu1 %914  ;;  %v930_v24 = vpop.permute.xlu0 %929  ;;  %v1119_v44 = vld [vmem:[%s1919_s8 + $0x120] sm:$0xff]  ;;  %v2181_v49 = vld [vmem:[#allocation12_spill] sm:$0xff] }
 0x339   : > { %1225 = vst [vmem:[%s1933_s11 + $0x70] sm:$0xff] %v1161_v43  ;;  %1226 = vst [vmem:[%s1933_s11 + $0x78] sm:$0xff] %v1162_v41  ;;  %v1037_v25 = vmul.f32 %v915_v47, %v1612_v18  ;;  %v1038_v32 = vmul.f32 %v915_v47, %v1615_v19  ;;  %v1043_v33 = vmul.f32 %v930_v24, %v1644_v30  ;;  %v2172_v19 = vld [vmem:[#allocation3_spill] sm:$0xff]  ;;  %v2182_v41 = vld [vmem:[#allocation17_spill] sm:$0xff] }
 0x33a   : > { %1231 = vst [vmem:[%s1933_s11 + $0xa0] sm:$0xff] %v1167_v45  ;;  %1232 = vst [vmem:[%s1933_s11 + $0xa8] sm:$0xff] %v1168_v37  ;;  %v1044_v16 = vmul.f32 %v930_v24, %v2171_v4  ;;  %v2183_v37 = vld [vmem:[#allocation18_spill] sm:$0xff]  ;;  %v1117_v24 = vld [vmem:[%s1919_s8 + $0x110] sm:$0xff] }
 0x33b   : > { %v1165_v10 = vadd.f32 %v1101_v60, %v1037_v25  ;;  %v1166_v11 = vadd.f32 %v1102_v8, %v1038_v32  ;;  %v1171_v28 = vadd.f32 %v1107_v9, %v1043_v33  ;;  %v1118_v25 = vld [vmem:[%s1919_s8 + $0x118] sm:$0xff]  ;;  %v1123_v33 = vld [vmem:[%s1919_s8 + $0x140] sm:$0xff]  ;;  %v1124_v4 = vld [vmem:[%s1919_s8 + $0x148] sm:$0xff] }
 0x33c   : > { %v1172_v52 = vadd.f32 %v1108_v2, %v1044_v16  ;;  %v923_v23 = vpop.permute.xlu1 %922  ;;  %v938_v18 = vpop.permute.xlu0 %937 }
 0x33d   : > { %1229 = vst [vmem:[%s1933_s11 + $0x90] sm:$0xff] %v1165_v10  ;;  %1230 = vst [vmem:[%s1933_s11 + $0x98] sm:$0xff] %v1166_v11  ;;  %v1041_v30 = vmul.f32 %v923_v23, %v2172_v19  ;;  %v1042_v40 = vmul.f32 %v923_v23, %v2173_v34  ;;  %v1047_v35 = vmul.f32 %v938_v18, %v2174_v59  ;;  %v2184_v10 = vld [vmem:[#allocation13_spill] sm:$0xff]  ;;  %v2187_v23 = vld [vmem:[#allocation16_spill] sm:$0xff] }
 0x33e   : > { %1235 = vst [vmem:[%s1933_s11 + $0xc0] sm:$0xff] %v1171_v28  ;;  %1236 = vst [vmem:[%s1933_s11 + $0xc8] sm:$0xff] %v1172_v52  ;;  %v1048_v0 = vmul.f32 %v938_v18, %v2175_v14  ;;  %v2185_v28 = vld [vmem:[#allocation14_spill] sm:$0xff]  ;;  %v1121_v34 = vld [vmem:[%s1919_s8 + $0x130] sm:$0xff] }
 0x33f   : > { %v1169_v1 = vadd.f32 %v1105_v61, %v1041_v30  ;;  %v1170_v15 = vadd.f32 %v1106_v22, %v1042_v40  ;;  %v1175_v56 = vadd.f32 %v1111_v7, %v1047_v35  ;;  %v2186_v61 = vld [vmem:[#allocation15_spill] sm:$0xff]  ;;  %v1122_v40 = vld [vmem:[%s1919_s8 + $0x138] sm:$0xff]  ;;  %v1127_v35 = vld [vmem:[%s1919_s8 + $0x160] sm:$0xff] }
 0x340   : > { %v1176_v48 = vadd.f32 %v1112_v55, %v1048_v0  ;;  %v934_v42 = vpop.permute.xlu1 %933  ;;  %v949_v62 = vpop.permute.xlu0 %948  ;;  %v1128_v14 = vld [vmem:[%s1919_s8 + $0x168] sm:$0xff] }
 0x341   : > { %1233 = vst [vmem:[%s1933_s11 + $0xb0] sm:$0xff] %v1169_v1  ;;  %1234 = vst [vmem:[%s1933_s11 + $0xb8] sm:$0xff] %v1170_v15  ;;  %v1045_v39 = vmul.f32 %v934_v42, %v2176_v63  ;;  %v1046_v12 = vmul.f32 %v934_v42, %v2177_v26  ;;  %v1051_v27 = vmul.f32 %v949_v62, %v2178_v13  ;;  %v2188_v1 = vld [vmem:[#allocation19_spill] sm:$0xff]  ;;  %v2191_v42 = vld [vmem:[#allocation22_spill] sm:$0xff] }
 0x342   : > { %1239 = vst [vmem:[%s1933_s11 + $0xe0] sm:$0xff] %v1175_v56  ;;  %1240 = vst [vmem:[%s1933_s11 + $0xe8] sm:$0xff] %v1176_v48  ;;  %v1052_v57 = vmul.f32 %v949_v62, %v2179_v31  ;;  %v2189_v56 = vld [vmem:[#allocation20_spill] sm:$0xff]  ;;  %v1132_v31 = vld [vmem:[%s1919_s8 + $0x188] sm:$0xff] }
 0x343   : > { %v1173_v17 = vadd.f32 %v1109_v29, %v1045_v39  ;;  %v1174_v54 = vadd.f32 %v1110_v46, %v1046_v12  ;;  %v1179_v3 = vadd.f32 %v1115_v36, %v1051_v27  ;;  %v2190_v29 = vld [vmem:[#allocation21_spill] sm:$0xff]  ;;  %v1125_v26 = vld [vmem:[%s1919_s8 + $0x150] sm:$0xff]  ;;  %v1131_v27 = vld [vmem:[%s1919_s8 + $0x180] sm:$0xff] }
 0x344   : > { %v1180_v58 = vadd.f32 %v1116_v53, %v1052_v57  ;;  %v942_v38 = vpop.permute.xlu1 %941  ;;  %v957_v6 = vpop.permute.xlu0 %956  ;;  %v1126_v12 = vld [vmem:[%s1919_s8 + $0x158] sm:$0xff] }
 0x345   : > { %1237 = vst [vmem:[%s1933_s11 + $0xd0] sm:$0xff] %v1173_v17  ;;  %1238 = vst [vmem:[%s1933_s11 + $0xd8] sm:$0xff] %v1174_v54  ;;  %v1049_v21 = vmul.f32 %v942_v38, %v2180_v20  ;;  %v1050_v43 = vmul.f32 %v942_v38, %v2181_v49  ;;  %v1055_v45 = vmul.f32 %v957_v6, %v2182_v41  ;;  %v1481_v17 = vld [vmem:[%s1561_s27 + $0x150] sm:$0xff]  ;;  %v1484_v38 = vld [vmem:[%s1561_s27 + $0x188] sm:$0xff] }
 0x346   : > { %1243 = vst [vmem:[%s1933_s11 + $0x100] sm:$0xff] %v1179_v3  ;;  %1244 = vst [vmem:[%s1933_s11 + $0x108] sm:$0xff] %v1180_v58  ;;  %v1056_v60 = vmul.f32 %v957_v6, %v2183_v37  ;;  %v1482_v3 = vld [vmem:[%s1561_s27 + $0x158] sm:$0xff]  ;;  %v1129_v49 = vld [vmem:[%s1919_s8 + $0x170] sm:$0xff] }
 0x347   : > { %v1177_v8 = vadd.f32 %v1113_v50, %v1049_v21  ;;  %v1178_v47 = vadd.f32 %v1114_v51, %v1050_v43  ;;  %v1183_v9 = vadd.f32 %v1119_v44, %v1055_v45  ;;  %v1483_v50 = vld [vmem:[%s1561_s27 + $0x180] sm:$0xff]  ;;  %v1130_v43 = vld [vmem:[%s1919_s8 + $0x178] sm:$0xff]  ;;  %v1136_v37 = vld [vmem:[%s1919_s8 + $0x1a8] sm:$0xff] }
 0x348   : > { %v1184_v2 = vadd.f32 %v1120_v5, %v1056_v60  ;;  %v953_v32 = vpop.permute.xlu1 %952  ;;  %v968_v16 = vpop.permute.xlu0 %967  ;;  %v1135_v45 = vld [vmem:[%s1919_s8 + $0x1a0] sm:$0xff] }
 0x349   : > { %1241 = vst [vmem:[%s1933_s11 + $0xf0] sm:$0xff] %v1177_v8  ;;  %1242 = vst [vmem:[%s1933_s11 + $0xf8] sm:$0xff] %v1178_v47  ;;  %v1053_v11 = vmul.f32 %v953_v32, %v2184_v10  ;;  %v1054_v52 = vmul.f32 %v953_v32, %v2185_v28  ;;  %v1059_v22 = vmul.f32 %v968_v16, %v2186_v61  ;;  %v1485_v8 = vld [vmem:[%s1561_s27 + $0x170] sm:$0xff]  ;;  %v1488_v32 = vld [vmem:[%s1561_s27 + $0x1a8] sm:$0xff] }
 0x34a   : > { %1247 = vst [vmem:[%s1933_s11 + $0x120] sm:$0xff] %v1183_v9  ;;  %1248 = vst [vmem:[%s1933_s11 + $0x128] sm:$0xff] %v1184_v2  ;;  %v1060_v7 = vmul.f32 %v968_v16, %v2187_v23  ;;  %v1486_v9 = vld [vmem:[%s1561_s27 + $0x178] sm:$0xff]  ;;  %v1133_v28 = vld [vmem:[%s1919_s8 + $0x190] sm:$0xff] }
 0x34b   : > { %v1181_v55 = vadd.f32 %v1117_v24, %v1053_v11  ;;  %v1182_v18 = vadd.f32 %v1118_v25, %v1054_v52  ;;  %v1187_v19 = vadd.f32 %v1123_v33, %v1059_v22  ;;  %v1487_v24 = vld [vmem:[%s1561_s27 + $0x1a0] sm:$0xff]  ;;  %v1134_v52 = vld [vmem:[%s1919_s8 + $0x198] sm:$0xff]  ;;  %v1140_v23 = vld [vmem:[%s1919_s8 + $0x1c8] sm:$0xff] }
 0x34c   : > { %v1188_v30 = vadd.f32 %v1124_v4, %v1060_v7  ;;  %v961_v59 = vpop.permute.xlu1 %960  ;;  %v976_v0 = vpop.permute.xlu0 %975  ;;  %v1139_v22 = vld [vmem:[%s1919_s8 + $0x1c0] sm:$0xff] }
 0x34d   : > { %1245 = vst [vmem:[%s1933_s11 + $0x110] sm:$0xff] %v1181_v55  ;;  %1246 = vst [vmem:[%s1933_s11 + $0x118] sm:$0xff] %v1182_v18  ;;  %v1057_v15 = vmul.f32 %v961_v59, %v2188_v1  ;;  %v1058_v48 = vmul.f32 %v961_v59, %v2189_v56  ;;  %v1063_v46 = vmul.f32 %v976_v0, %v2190_v29  ;;  %v1489_v55 = vld [vmem:[%s1561_s27 + $0x190] sm:$0xff]  ;;  %v1492_v59 = vld [vmem:[%s1561_s27 + $0x1c8] sm:$0xff] }
 0x34e   : > { %1251 = vst [vmem:[%s1933_s11 + $0x140] sm:$0xff] %v1187_v19  ;;  %1252 = vst [vmem:[%s1933_s11 + $0x148] sm:$0xff] %v1188_v30  ;;  %v1064_v36 = vmul.f32 %v976_v0, %v2191_v42  ;;  %v1490_v19 = vld [vmem:[%s1561_s27 + $0x198] sm:$0xff]  ;;  %v1137_v56 = vld [vmem:[%s1919_s8 + $0x1b0] sm:$0xff] }
 0x34f   : > { %v1185_v53 = vadd.f32 %v1121_v34, %v1057_v15  ;;  %v1186_v62 = vadd.f32 %v1122_v40, %v1058_v48  ;;  %v1191_v63 = vadd.f32 %v1127_v35, %v1063_v46  ;;  %v1491_v34 = vld [vmem:[%s1561_s27 + $0x1c0] sm:$0xff]  ;;  %v1138_v48 = vld [vmem:[%s1919_s8 + $0x1b8] sm:$0xff]  ;;  %v1144_v42 = vld [vmem:[%s1919_s8 + $0x1e8] sm:$0xff] }
 0x350   : > { %v1192_v39 = vadd.f32 %v1128_v14, %v1064_v36  ;;  %v972_v13 = vpop.permute.xlu1 %971  ;;  %v987_v57 = vpop.permute.xlu0 %986  ;;  %v1143_v46 = vld [vmem:[%s1919_s8 + $0x1e0] sm:$0xff] }
 0x351   : > { %1249 = vst [vmem:[%s1933_s11 + $0x130] sm:$0xff] %v1185_v53  ;;  %1250 = vst [vmem:[%s1933_s11 + $0x138] sm:$0xff] %v1186_v62  ;;  %v1061_v54 = vmul.f32 %v1481_v17, %v972_v13  ;;  %v1062_v58 = vmul.f32 %v1482_v3, %v972_v13  ;;  %v1067_v51 = vmul.f32 %v1483_v50, %v987_v57  ;;  %v1493_v53 = vld [vmem:[%s1561_s27 + $0x1b0] sm:$0xff]  ;;  %v1496_v13 = vld [vmem:[%s1561_s27 + $0x1e8] sm:$0xff] }
 0x352   : > { %1255 = vst [vmem:[%s1933_s11 + $0x160] sm:$0xff] %v1191_v63  ;;  %1256 = vst [vmem:[%s1933_s11 + $0x168] sm:$0xff] %v1192_v39  ;;  %v1068_v44 = vmul.f32 %v1484_v38, %v987_v57  ;;  %v1494_v63 = vld [vmem:[%s1561_s27 + $0x1b8] sm:$0xff]  ;;  %v1141_v3 = vld [vmem:[%s1919_s8 + $0x1d0] sm:$0xff] }
 0x353   : > { %v1189_v5 = vadd.f32 %v1125_v26, %v1061_v54  ;;  %v1190_v6 = vadd.f32 %v1126_v12, %v1062_v58  ;;  %v1195_v20 = vadd.f32 %v1131_v27, %v1067_v51  ;;  %v1495_v26 = vld [vmem:[%s1561_s27 + $0x1e0] sm:$0xff]  ;;  %v1142_v58 = vld [vmem:[%s1919_s8 + $0x1d8] sm:$0xff]  ;;  %v1497_v51 = vld [vmem:[%s1561_s27 + $0x1d0] sm:$0xff] }
 0x354   : > { %v1196_v21 = vadd.f32 %v1132_v31, %v1068_v44  ;;  %v980_v41 = vpop.permute.xlu1 %979  ;;  %v995_v60 = vpop.permute.xlu0 %994  ;;  %v1498_v44 = vld [vmem:[%s1561_s27 + $0x1d8] sm:$0xff] }
 0x355   : > { %1253 = vst [vmem:[%s1933_s11 + $0x150] sm:$0xff] %v1189_v5  ;;  %1254 = vst [vmem:[%s1933_s11 + $0x158] sm:$0xff] %v1190_v6  ;;  %v1065_v47 = vmul.f32 %v1485_v8, %v980_v41  ;;  %v1066_v2 = vmul.f32 %v1486_v9, %v980_v41  ;;  %v1071_v25 = vmul.f32 %v1487_v24, %v995_v60  ;;  %v1499_v41 = vld [vmem:[%s1561_s27 + $0x1f0] sm:$0xff] }
 0x356   : > { %1259 = vst [vmem:[%s1933_s11 + $0x180] sm:$0xff] %v1195_v20  ;;  %1260 = vst [vmem:[%s1933_s11 + $0x188] sm:$0xff] %v1196_v21  ;;  %v1072_v33 = vmul.f32 %v1488_v32, %v995_v60  ;;  %v1145_v21 = vld [vmem:[%s1919_s8 + $0x1f0] sm:$0xff] }
 0x357   : > { %v1193_v4 = vadd.f32 %v1129_v49, %v1065_v47  ;;  %v1194_v16 = vadd.f32 %v1130_v43, %v1066_v2  ;;  %v1199_v10 = vadd.f32 %v1135_v45, %v1071_v25  ;;  %v1146_v49 = vld [vmem:[%s1919_s8 + $0x1f8] sm:$0xff] }
 0x358   : > { %v1200_v11 = vadd.f32 %v1136_v37, %v1072_v33  ;;  %v991_v61 = vpop.permute.xlu1 %990  ;;  %v1006_v7 = vpop.permute.xlu0 %1005  ;;  %v1500_v37 = vld [vmem:[%s1561_s27 + $0x1f8] sm:$0xff] }
 0x359   : > { %1257 = vst [vmem:[%s1933_s11 + $0x170] sm:$0xff] %v1193_v4  ;;  %1258 = vst [vmem:[%s1933_s11 + $0x178] sm:$0xff] %v1194_v16  ;;  %v1069_v18 = vmul.f32 %v1489_v55, %v991_v61  ;;  %v1070_v30 = vmul.f32 %v1490_v19, %v991_v61  ;;  %v1075_v40 = vmul.f32 %v1491_v34, %v1006_v7 }
 0x35a   : > { %1263 = vst [vmem:[%s1933_s11 + $0x1a0] sm:$0xff] %v1199_v10  ;;  %1264 = vst [vmem:[%s1933_s11 + $0x1a8] sm:$0xff] %v1200_v11  ;;  %v1076_v35 = vmul.f32 %v1492_v59, %v1006_v7 }
 0x35b   : > { %v1197_v14 = vadd.f32 %v1133_v28, %v1069_v18  ;;  %v1198_v0 = vadd.f32 %v1134_v52, %v1070_v30  ;;  %v1203_v1 = vadd.f32 %v1139_v22, %v1075_v40 }
 0x35c   : > { %v1204_v15 = vadd.f32 %v1140_v23, %v1076_v35  ;;  %v999_v29 = vpop.permute.xlu1 %998  ;;  %v1014_v36 = vpop.permute.xlu0 %1013 }
 0x35d   : > { %1261 = vst [vmem:[%s1933_s11 + $0x190] sm:$0xff] %v1197_v14  ;;  %1262 = vst [vmem:[%s1933_s11 + $0x198] sm:$0xff] %v1198_v0  ;;  %v1073_v62 = vmul.f32 %v1493_v53, %v999_v29  ;;  %v1074_v39 = vmul.f32 %v1494_v63, %v999_v29  ;;  %v1079_v12 = vmul.f32 %v1495_v26, %v1014_v36 }
 0x35e   : > { %1267 = vst [vmem:[%s1933_s11 + $0x1c0] sm:$0xff] %v1203_v1  ;;  %1268 = vst [vmem:[%s1933_s11 + $0x1c8] sm:$0xff] %v1204_v15  ;;  %v1080_v27 = vmul.f32 %v1496_v13, %v1014_v36 }
 0x35f   : > { %v1201_v31 = vadd.f32 %v1137_v56, %v1073_v62  ;;  %v1202_v57 = vadd.f32 %v1138_v48, %v1074_v39  ;;  %v1207_v17 = vadd.f32 %v1143_v46, %v1079_v12 }
 0x360   : > { %v1208_v54 = vadd.f32 %v1144_v42, %v1080_v27  ;;  %v1010_v50 = vpop.permute.xlu1 %1009 }
 0x361   : > { %1265 = vst [vmem:[%s1933_s11 + $0x1b0] sm:$0xff] %v1201_v31  ;;  %1266 = vst [vmem:[%s1933_s11 + $0x1b8] sm:$0xff] %v1202_v57  ;;  %v1077_v38 = vmul.f32 %v1497_v51, %v1010_v50  ;;  %v1078_v5 = vmul.f32 %v1498_v44, %v1010_v50 }
 0x362   : > { %1271 = vst [vmem:[%s1933_s11 + $0x1e0] sm:$0xff] %v1207_v17  ;;  %1272 = vst [vmem:[%s1933_s11 + $0x1e8] sm:$0xff] %v1208_v54 }
 0x363   : > { %v1205_v6 = vadd.f32 %v1141_v3, %v1077_v38  ;;  %v1206_v20 = vadd.f32 %v1142_v58, %v1078_v5 }
 0x364   : > { %v1018_v43 = vpop.permute.xlu1 %1017 }
 0x365   : > { %1269 = vst [vmem:[%s1933_s11 + $0x1d0] sm:$0xff] %v1205_v6  ;;  %1270 = vst [vmem:[%s1933_s11 + $0x1d8] sm:$0xff] %v1206_v20  ;;  %v1081_v45 = vmul.f32 %v1499_v41, %v1018_v43  ;;  %v1082_v60 = vmul.f32 %v1500_v37, %v1018_v43 }
 0x367   : > { %v1209_v8 = vadd.f32 %v1145_v21, %v1081_v45  ;;  %v1210_v47 = vadd.f32 %v1146_v49, %v1082_v60 }
 0x369   : > { %1273 = vst [vmem:[%s1933_s11 + $0x1f0] sm:$0xff] %v1209_v8  ;;  %1274 = vst [vmem:[%s1933_s11 + $0x1f8] sm:$0xff] %v1210_v47 }
 0x36a PF: > { %s16_s21 = sadd.s32 1, %s1507_s21  }
 0x36b   : > { %p13_p4 = scmp.ge.s32.totalorder %s16_s21, 4  }
 0x36d   :  { %15 = sbr.rel (!%p13_p4) target bundleno = 1 (0x1), region = 77 }

</bundles_post_ra>
